<compile_context>
chip_gen: v5e
topology: v5e:2x2
jax: 0.10.0
libtpu: 0.0.40
codegen_flags: <defaults>
</compile_context>

<pallas_src>
import functools

import jax
import jax.numpy as jnp
from jax.experimental import pallas as pl
from jax.experimental.pallas import tpu as pltpu


def _bpr_max_reg_kernel(lambda_, n_rows, tile_n, logits_ref, negmask_ref, out_ref):
    i = pl.program_id(0)

    x = logits_ref[...].astype(jnp.float32)            # (tile_n, M), compute in f32
    neg = negmask_ref[...] != 0                         # True => negative sample

    # Diagonal (positive score) per row, offset by the tile's row origin.
    row = jax.lax.broadcasted_iota(jnp.int32, x.shape, 0) + i * tile_n
    col = jax.lax.broadcasted_iota(jnp.int32, x.shape, 1)
    diag_mask = row == col
    positives = jnp.sum(jnp.where(diag_mask, x, 0.0), axis=1, keepdims=True)  # (tile_n,1)

    # Row-wise softmax pieces (the ONLY per-element exp in the kernel).
    m = jnp.max(x, axis=1, keepdims=True)
    e = jnp.exp(x - m)                                  # (tile_n, M)
    sum_e = jnp.sum(e, axis=1, keepdims=True)           # (tile_n, 1)

    # sigmoid(pos - x) = 1 / (1 + exp(x - pos)) = 1 / (1 + e * exp(m - pos))
    # exp(m - pos) is one exp per ROW; clamp to avoid overflow for extreme rows.
    scale = jnp.exp(jnp.minimum(m - positives, 60.0))   # (tile_n, 1)
    sig = pl.reciprocal(1.0 + e * scale, approx=True)   # (tile_n, M)

    # masked numerators (softmax denominator factored out of the loss log).
    loss_num = jnp.sum(jnp.where(neg, e * sig, 0.0), axis=1, keepdims=True)
    reg_num = jnp.sum(jnp.where(neg, e * x * x, 0.0), axis=1, keepdims=True)

    inv_sum_e = pl.reciprocal(sum_e, approx=True)
    per_row = (-jnp.log(loss_num) + jnp.log(sum_e)
               + lambda_ * reg_num * inv_sum_e)          # (tile_n, 1)

    # Rows past n_rows are padding -> contribute exactly 0 to the final sum.
    row_idx = jax.lax.broadcasted_iota(jnp.int32, (tile_n, 1), 0) + i * tile_n
    valid = row_idx < n_rows
    out_ref[...] = jnp.where(valid, per_row, 0.0)


def bpr_max_reg(logits_scores, negative_mask, lambda_, *, tile_n=128):
    """Pallas TPU implementation of BPR_max_reg.forward (returns a scalar)."""
    N, M = logits_scores.shape
    assert N <= M, "diag() semantics require #pos_targets <= #candidates"

    # Row tile: multiple of 8 sublanes, capped at 128; pad rows so the grid
    # tiles the arrays exactly (padded rows are masked to 0 inside the kernel).
    tile_n = min(tile_n, ((N + 7) // 8) * 8)
    num_tiles = pl.cdiv(N, tile_n)
    n_pad = num_tiles * tile_n
    if n_pad != N:
        logits_scores = jnp.pad(logits_scores, ((0, n_pad - N), (0, 0)))
        negative_mask = jnp.pad(negative_mask, ((0, n_pad - N), (0, 0)))

    neg_i8 = negative_mask.astype(jnp.int8)              # 1 B/elem mask traffic
    itemsize = jnp.dtype(logits_scores.dtype).itemsize

    kernel = functools.partial(_bpr_max_reg_kernel, float(lambda_), N, tile_n)
    cost = pl.CostEstimate(
        flops=12 * N * M,
        transcendentals=N * M + 3 * N,
        bytes_accessed=N * M * (itemsize + 1) + n_pad * 4,
    )

    per_row = pl.pallas_call(
        kernel,
        grid=(num_tiles,),
        in_specs=[
            pl.BlockSpec((tile_n, M), lambda i: (i, 0)),
            pl.BlockSpec((tile_n, M), lambda i: (i, 0)),
        ],
        out_specs=pl.BlockSpec((tile_n, 1), lambda i: (i, 0)),
        out_shape=jax.ShapeDtypeStruct((n_pad, 1), jnp.float32),
        compiler_params=pltpu.CompilerParams(
            dimension_semantics=("parallel",),
            vmem_limit_bytes=32 * 1024 * 1024,
        ),
        cost_estimate=cost,
    )(logits_scores, neg_i8)

    # Final mean over the N real rows (padded rows were written as 0).
    return jnp.sum(per_row) / jnp.float32(N)


def bpr_max_reg_ref(logits, negmask, lambda_):
    """Pure-JAX reference (mirrors the PyTorch module)."""
    pos_mask = ~negmask
    positives = jnp.diagonal(logits)[:, None]
    diff = positives - logits
    loss = jax.nn.sigmoid(diff)
    sm = jax.nn.softmax(logits, axis=1)
    loss = sm * loss
    reg = sm * logits ** 2
    loss = jnp.where(pos_mask, 0.0, loss)
    reg = jnp.where(pos_mask, 0.0, reg)
    per = -jnp.log(loss.sum(axis=1)) + lambda_ * reg.sum(axis=1)
    return jnp.mean(per)


if __name__ == "__main__":
    lambda_ = 0.5  # deterministic "parameter" of the module

    key = jax.random.PRNGKey(0)
    # #pos_targets=200, #candidates=256: exercises 2 row tiles + ragged tail.
    N, M = 200, 256
    logits_scores = jax.random.normal(key, (N, M), dtype=jnp.float32)
    # Every off-diagonal item is a negative sample for the row's positive target.
    negative_mask = ~jnp.eye(N, M, dtype=bool)

    out = bpr_max_reg(logits_scores, negative_mask, lambda_)
    out = jax.block_until_ready(out)

    ref = bpr_max_reg_ref(logits_scores, negative_mask, lambda_)
    # approx EUP reciprocals introduce ~1e-4-level error; well inside 2e-3.
    assert jnp.allclose(out, ref, rtol=2e-3, atol=2e-3), (out, ref)

    print("KERNEL_OK")
</pallas_src>

<mosaic_0001>
module attributes {stable_mosaic.version = 11 : i64} {
  func.func @_bpr_max_reg_kernel(%arg0: i32, %arg1: memref<128x256xf32, #tpu.memory_space<vmem>>, %arg2: memref<128x256xi8, #tpu.memory_space<vmem>>, %arg3: memref<128x1xf32, #tpu.memory_space<vmem>>) attributes {dimension_semantics = [#tpu.dimension_semantics<parallel>], iteration_bounds = array<i64: 2>, scalar_prefetch = 0 : i64, scratch_operands = 0 : i64, tpu.core_type = #tpu.core_type<tc>, window_params = [{transform_indices = @transform_0, window_bounds = array<i64: 128, 256>}, {transform_indices = @transform_1, window_bounds = array<i64: 128, 256>}, {transform_indices = @transform_2, window_bounds = array<i64: 128, 1>}]} {
    %c0 = arith.constant 0 : index
    %c0_0 = arith.constant 0 : index
    %0 = vector.load %arg1[%c0, %c0_0] : memref<128x256xf32, #tpu.memory_space<vmem>>, vector<128x256xf32>
    %c0_1 = arith.constant 0 : index
    %c0_2 = arith.constant 0 : index
    %1 = vector.load %arg2[%c0_1, %c0_2] : memref<128x256xi8, #tpu.memory_space<vmem>>, vector<128x256xi8>
    %c0_i8 = arith.constant 0 : i8
    %2 = vector.broadcast %c0_i8 : i8 to vector<128x256xi8>
    %3 = arith.cmpi ne, %1, %2 : vector<128x256xi8>
    %4 = tpu.iota {dimensions = array<i32: 0>} : vector<128x256xi32>
    %c128_i32 = arith.constant 128 : i32
    %5 = arith.muli %arg0, %c128_i32 : i32
    %6 = vector.broadcast %5 : i32 to vector<128x256xi32>
    %7 = arith.addi %4, %6 : vector<128x256xi32>
    %8 = tpu.iota {dimensions = array<i32: 1>} : vector<128x256xi32>
    %9 = arith.cmpi eq, %7, %8 : vector<128x256xi32>
    %cst = arith.constant 0.000000e+00 : f32
    %10 = vector.broadcast %cst : f32 to vector<128x256xf32>
    %11 = arith.select %9, %0, %10 : vector<128x256xi1>, vector<128x256xf32>
    %cst_3 = arith.constant dense<0.000000e+00> : vector<128xf32>
    %12 = vector.multi_reduction <add>, %11, %cst_3 [1] : vector<128x256xf32> to vector<128xf32>
    %13 = vector.shape_cast %12 : vector<128xf32> to vector<128x1xf32>
    %cst_4 = arith.constant dense<0xFF800000> : vector<128xf32>
    %14 = vector.multi_reduction <maximumf>, %0, %cst_4 [1] : vector<128x256xf32> to vector<128xf32>
    %15 = vector.shape_cast %14 : vector<128xf32> to vector<128x1xf32>
    %16 = vector.broadcast %15 : vector<128x1xf32> to vector<128x256xf32>
    %17 = arith.subf %0, %16 : vector<128x256xf32>
    %18 = math.exp %17 : vector<128x256xf32>
    %cst_5 = arith.constant dense<0.000000e+00> : vector<128xf32>
    %19 = vector.multi_reduction <add>, %18, %cst_5 [1] : vector<128x256xf32> to vector<128xf32>
    %20 = vector.shape_cast %19 : vector<128xf32> to vector<128x1xf32>
    %21 = arith.subf %15, %13 : vector<128x1xf32>
    %cst_6 = arith.constant 6.000000e+01 : f32
    %22 = vector.broadcast %cst_6 : f32 to vector<128x1xf32>
    %23 = arith.minimumf %21, %22 : vector<128x1xf32>
    %24 = math.exp %23 : vector<128x1xf32>
    %25 = vector.broadcast %24 : vector<128x1xf32> to vector<128x256xf32>
    %26 = arith.mulf %18, %25 : vector<128x256xf32>
    %cst_7 = arith.constant 1.000000e+00 : f32
    %27 = vector.broadcast %cst_7 : f32 to vector<128x256xf32>
    %28 = arith.addf %27, %26 : vector<128x256xf32>
    %29 = tpu.reciprocal %28 {approx = true} : vector<128x256xf32> -> vector<128x256xf32>
    %30 = arith.mulf %18, %29 : vector<128x256xf32>
    %cst_8 = arith.constant 0.000000e+00 : f32
    %31 = vector.broadcast %cst_8 : f32 to vector<128x256xf32>
    %32 = arith.select %3, %30, %31 : vector<128x256xi1>, vector<128x256xf32>
    %cst_9 = arith.constant dense<0.000000e+00> : vector<128xf32>
    %33 = vector.multi_reduction <add>, %32, %cst_9 [1] : vector<128x256xf32> to vector<128xf32>
    %34 = vector.shape_cast %33 : vector<128xf32> to vector<128x1xf32>
    %35 = arith.mulf %18, %0 : vector<128x256xf32>
    %36 = arith.mulf %35, %0 : vector<128x256xf32>
    %cst_10 = arith.constant 0.000000e+00 : f32
    %37 = vector.broadcast %cst_10 : f32 to vector<128x256xf32>
    %38 = arith.select %3, %36, %37 : vector<128x256xi1>, vector<128x256xf32>
    %cst_11 = arith.constant dense<0.000000e+00> : vector<128xf32>
    %39 = vector.multi_reduction <add>, %38, %cst_11 [1] : vector<128x256xf32> to vector<128xf32>
    %40 = vector.shape_cast %39 : vector<128xf32> to vector<128x1xf32>
    %41 = tpu.reciprocal %20 {approx = true} : vector<128x1xf32> -> vector<128x1xf32>
    %42 = math.log %34 : vector<128x1xf32>
    %cst_12 = arith.constant 0.000000e+00 : f32
    %43 = vector.broadcast %cst_12 : f32 to vector<128x1xf32>
    %44 = arith.subf %43, %42 : vector<128x1xf32>
    %45 = math.log %20 : vector<128x1xf32>
    %46 = arith.addf %44, %45 : vector<128x1xf32>
    %cst_13 = arith.constant 5.000000e-01 : f32
    %47 = vector.broadcast %cst_13 : f32 to vector<128x1xf32>
    %48 = arith.mulf %47, %40 : vector<128x1xf32>
    %49 = arith.mulf %48, %41 : vector<128x1xf32>
    %50 = arith.addf %46, %49 : vector<128x1xf32>
    %51 = tpu.iota {dimensions = array<i32: 0>} : vector<128x1xi32>
    %c128_i32_14 = arith.constant 128 : i32
    %52 = arith.muli %arg0, %c128_i32_14 : i32
    %53 = vector.broadcast %52 : i32 to vector<128x1xi32>
    %54 = arith.addi %51, %53 : vector<128x1xi32>
    %c200_i32 = arith.constant 200 : i32
    %55 = vector.broadcast %c200_i32 : i32 to vector<128x1xi32>
    %56 = arith.cmpi slt, %54, %55 : vector<128x1xi32>
    %cst_15 = arith.constant 0.000000e+00 : f32
    %57 = vector.broadcast %cst_15 : f32 to vector<128x1xf32>
    %58 = arith.select %56, %50, %57 : vector<128x1xi1>, vector<128x1xf32>
    %c0_16 = arith.constant 0 : index
    %c0_17 = arith.constant 0 : index
    %59 = vector.load %arg3[%c0_16, %c0_17] : memref<128x1xf32, #tpu.memory_space<vmem>>, vector<128x1xf32>
    tpu.vector_store %arg3[%c0_16, %c0_17], %58 {strides = array<i32>} : memref<128x1xf32, #tpu.memory_space<vmem>>, vector<128x1xf32>,
    return
  }
  func.func @transform_0(%arg0: i32) -> (i32, i32) {
    %c0_i32 = arith.constant 0 : i32
    %c0_i32_0 = arith.constant 0 : i32
    return %arg0, %c0_i32 : i32, i32
  }
  func.func @transform_1(%arg0: i32) -> (i32, i32) {
    %c0_i32 = arith.constant 0 : i32
    %c0_i32_0 = arith.constant 0 : i32
    return %arg0, %c0_i32 : i32, i32
  }
  func.func @transform_2(%arg0: i32) -> (i32, i32) {
    %c0_i32 = arith.constant 0 : i32
    %c0_i32_0 = arith.constant 0 : i32
    return %arg0, %c0_i32 : i32, i32
  }
}

</mosaic_0001>

<bundles_post_ra>
// kernel: tpu_custom_call.1
= control target key start
LH: loop header
LB: loop body
LE: loop exit
PB: predicated region body
PF: predicated region fallthrough
CT: control target
= control target key end

     0   :  { %7 = vsyncpa [#allocation3], 0  ;;  %s3338_s0 = inlined_call_operand.hbm [shape: f32[256,256], index: 0, kind: input, shape index: {}]   ;;  %s3339_s1 = inlined_call_operand.hbm [shape: s8[256,256], index: 1, kind: input, shape index: {}]   ;;  %s3340_s2 = inlined_call_operand.vmem [shape: f32[256,1], index: 2, kind: output, shape index: {}]  }
   0x1   :  { %9 = vsyncpa [#allocation3 + $0x1], 0 }
   0x2   :  { %10 = vsyncpa [#allocation5], 0 }
   0x3   :  { %12 = vsyncpa [#allocation5 + $0x1], 0  ;;  %s1965_s9 = smov 0   ;;  %s1967_s10 = smov 0  }
   0x4   :  { %s1969_s11 = smov 0   ;;  %s1971_s12 = smov 0  }
   0x5 LB: > { %s1984_s13 = sadd.s32 4294967295, %s1945_s12   ;;  %s1987_s14 = sadd.s32 1, %s1945_s12   ;;  %s1945_s12 = sphi %s1971_s12, %s3606_s12   ;;  %s1941_s11 = sphi %s1969_s11, %s3605_s11   ;;  %s1937_s10 = sphi %s1967_s10, %s3604_s10   ;;  %s1933_s9 = sphi %s1965_s9, %s3603_s9  }
   0x6   : > { %s22_s15 = ssub.s32 %s1945_s12, %s1987_s14  ;;  %s25_s16 = sadd.s32 1, %s1941_s11 }
   0x7   : > { %p23_p0 = scmp.eq.s32.totalorder %s22_s15, 0  ;;  %p32_p1 = scmp.ne.s32.totalorder %s1941_s11, %s1937_s10 }
   0x8   : > { %p33_p2 = scmp.eq.s32.totalorder %s1945_s12, 0  ;;  %p38_p3 = scmp.ne.s32.totalorder %s1937_s10, %s1933_s9 }
   0x9   : > { %s1997_s17 = scalar_select %p23_p0, %s1941_s11, %s25_s16  }
   0xa   : > { %p1999_p4 = por %p33_p2, %p32_p1  ;;  %p39_p5 = scmp.eq.s32.totalorder %s1984_s13, 0 }
   0xb   : > { %p1523_p6 = scmp.lt.s32.totalorder %s1945_s12, 2  ;;  %s2010_s20 = sand.u32 1, %s1941_s11  }
   0xc   : > { %p2005_p7 = por %p39_p5, %p38_p3  ;;  %s1492_s21 = sshll.u32 %s2010_s20, 8 }
   0xd   : > { %s1509_s22 = sshll.u32 %s1945_s12, 8  ;;  %s118_s26 = scalar_lea.vmem [#allocation2], %s1492_s21 }
   0xe   : > { %s124_s25 = scalar_lea.hbm %s3338_s0, %s1509_s22  ;;  %s127_s27 = sshll.u32 %s118_s26, 4  ;;  %s128_s27 = int_to_ptr.vmem [resolvable:$true] %s127_s27 }
   0xf   : > { %s125_s28 = sshll.u32 %s124_s25, 4  ;;  %p2019_p8 = pnand %p1523_p6, %p1999_p4  ;;  %s126_s28 = int_to_ptr.hbm [resolvable:$true] %s125_s28 }
  0x10   : > { %p1500_p9 = scmp.ge.s32.totalorder %s1945_s12, 1  ;;  %s115_s30 = scalar_lea.sflag [#allocation3], %s2010_s20 }
  0x11   : > { %s1847_s3 = sshra.s32 %s126_s28, 4  ;;  %p1851_p11 = pneg %p2019_p8  ;;  %s1848_s3 = int_to_ptr.hbm [resolvable:$true] %s1847_s3 }
  0x12   : > { %s1849_s4 = scalar_lea.hbm %s1848_s3, 256  ;;  %s1854_s7 = scalar_lea.hbm %s3338_s0, 512 }
  0x13   : > { %p1850_p10 = scmp.ne.s32.totalorder %s1848_s3, %s1849_s4  ;;  %p1855_p0 = scmp.lt.s32.totalorder %s1848_s3, %s3338_s0 }
  0x14   : > { %p1856_p1 = scmp.lt.s32.totalorder %s1854_s7, %s1849_s4 }
  0x15   : > { %p1852_p12 = pnand %p1851_p11, %p1850_p10 }
  0x16   : > { %p1857_p2 = por %p1856_p1, %p1855_p0 }
  0x17   : > { %p1853_p13 = pneg %p1852_p12 }
  0x19   : > { %p1858_p3 = pnand %p1857_p2, %p1853_p13 }
  0x1b   : > { %1861 = shalt.err (!%p1858_p3)
}
  0x1c   : > { %s1947_s15 = smov 256   ;;  %s1948_s16 = smov 16  }
  0x1d   : > { %1519 = dma.hbm_to_vmem [thread:$0]  (!%p2019_p8), %s126_s28, 4096, %s128_s27, %s115_s30, %s1947_s15, %s1947_s15, %s1948_s16  }
  0x1e   : > { %p158_p4 = scmp.lt.s32.totalorder %s1945_s12, 3  ;;  %s1496_s18 = sshll.u32 %s2010_s20, 6 }
  0x1f   : > { %s1511_s21 = sshll.u32 %s1945_s12, 6  ;;  %s141_s26 = scalar_lea.vmem [#allocation4], %s1496_s18 }
  0x20   : > { %p2046_p5 = pnand %p1500_p9, %p158_p4  ;;  %s147_s25 = scalar_lea.hbm %s3339_s1, %s1511_s21 }
  0x21   : > { %s150_s3 = sshll.u32 %s141_s26, 4  ;;  %s148_s4 = sshll.u32 %s147_s25, 4  ;;  %s151_s3 = int_to_ptr.vmem [resolvable:$true] %s150_s3  ;;  %s149_s4 = int_to_ptr.hbm [resolvable:$true] %s148_s4 }
  0x22   : > { %s138_s5 = scalar_lea.sflag [#allocation5], %s2010_s20  ;;  %s1877_s27 = sshra.s32 %s149_s4, 4  ;;  %s1878_s27 = int_to_ptr.hbm [resolvable:$true] %s1877_s27 }
  0x23   : > { %s1879_s28 = scalar_lea.hbm %s1878_s27, 64  ;;  %s1884_s6 = scalar_lea.hbm %s3339_s1, 128 }
  0x24   : > { %p1880_p6 = scmp.ne.s32.totalorder %s1878_s27, %s1879_s28  ;;  %p1885_p12 = scmp.lt.s32.totalorder %s1878_s27, %s3339_s1 }
  0x25   : > { %p1886_p13 = scmp.lt.s32.totalorder %s1884_s6, %s1879_s28 }
  0x26   : > { %p1882_p9 = pnand %p1880_p6, %p1851_p11 }
  0x27   : > { %p1887_p0 = por %p1886_p13, %p1885_p12 }
  0x28   : > { %p1883_p10 = pneg %p1882_p9 }
  0x2a   : > { %p1888_p1 = pnand %p1887_p0, %p1883_p10 }
  0x2c   : > { %1891 = shalt.err (!%p1888_p1)
}
  0x2d   : > { %1522 = dma.hbm_to_vmem [thread:$0]  (!%p2019_p8), %s149_s4, 1024, %s151_s3, %s138_s5, %s1947_s15, %s1947_s15, %s1948_s16  }
  0x2e   : > { %162 = sbr.rel (%p2046_p5) target bundleno = 543 (0x21f), region = 28 }
  0x33   : > { %s164_s20 = sand.u32 1, %s1937_s10  }
  0x34   : > { %s1501_s9 = sshll.u32 %s164_s20, 8  ;;  %s165_s18 = scalar_lea.sflag [#allocation3], %s164_s20 }
  0x35   : > { %s2071_s21 = scalar_lea.vmem [#allocation2], %s1501_s9 }
  0x36   : > { %1924 = dma.done.wait (%p2005_p7), %s165_s18, 4096  }
  0x37   : > { %1926 = vsyncadd (%p2005_p7), %s165_s18, 4294963200  ;;  %s1502_s29 = sshll.u32 %s164_s20, 6  ;;  %s175_s23 = scalar_lea.sflag [#allocation5], %s164_s20 }
  0x38   : > { %s2077_s24 = scalar_lea.vmem [#allocation4], %s1502_s29 }
  0x39   : > { %1928 = dma.done.wait (%p2005_p7), %s175_s23, 1024  }
  0x3a   : > { %1930 = vsyncadd (%p2005_p7), %s175_s23, 4294966272  ;;  %v263_v0 = vlaneseq  ;;  %s1505_s15 = sshll.u32 %s1984_s13, 7  ;;  %v2114_v14 = vld [vmem:[%s2071_s21] sm:$0xff]  ;;  %v2117_v15 = vld [vmem:[%s2071_s21 + $0x8] sm:$0xff]  ;;  %s1503_s19 = sshll.u32 %s1984_s13, 4 }
  0x3b   : > { %v2084_v1 = vstv %s1505_s15  ;;  %v2120_v16 = vld [vmem:[%s2071_s21 + $0x40] sm:$0xff]  ;;  %v2137_v23 = vld [vmem:[%s2071_s21 + $0x48] sm:$0xff]  ;;  %v2154_v29 = vld [vmem:[%s2071_s21 + $0x10] sm:$0xff]  ;;  %p208_p7 = scmp.lt.s32.totalorder %s1503_s19, 31 }
  0x3c   : > { %v2086_v2 = vshrl.u32 %v263_v0, 7  ;;  %v2088_v3 = vand.u32 127, %v263_v0  ;;  %v2144_v24 = vld [vmem:[%s2071_s21 + $0x20] sm:$0xff]  ;;  %v2147_v25 = vld [vmem:[%s2071_s21 + $0x28] sm:$0xff]  ;;  %v2157_v30 = vld [vmem:[%s2071_s21 + $0x18] sm:$0xff] }
  0x3d   : > { %v2160_v31 = vld [vmem:[%s2071_s21 + $0x50] sm:$0xff]  ;;  %v2168_v34 = vld [vmem:[%s2071_s21 + $0x58] sm:$0xff]  ;;  %v2195_v48 = vld [vmem:[%s2071_s21 + $0x60] sm:$0xff]  ;;  %s3608_s19 = smov (!%p208_p7, %s1503_s19), 31 }
  0x3e   : > { %v2092_v4 = vadd.s32 %v2084_v1, %v2086_v2  ;;  %v2095_v5 = vadd.s32 128, %v2088_v3  ;;  %v268_v6 = vadd.s32 32, %v2086_v2  ;;  %v266_v7 = vadd.s32 16, %v2086_v2  ;;  %v2181_v40 = vld [vmem:[%s2071_s21 + $0x30] sm:$0xff]  ;;  %v2184_v41 = vld [vmem:[%s2071_s21 + $0x38] sm:$0xff]  ;;  %v2198_v49 = vld [vmem:[%s2071_s21 + $0x68] sm:$0xff] }
  0x3f   : > { %v265_v8 = vadd.s32 8, %v2086_v2  ;;  %v269_v9 = vadd.s32 40, %v2086_v2  ;;  %v267_v10 = vadd.s32 24, %v2086_v2  ;;  %v270_v11 = vadd.s32 48, %v2086_v2  ;;  %v2210_v54 = vld [vmem:[%s2071_s21 + $0x80] sm:$0xff]  ;;  %v2213_v55 = vld [vmem:[%s2071_s21 + $0x88] sm:$0xff] }
  0x40   : > { %3428 = vst [vmem:[#allocation8_spill] sm:$0xff] %v2092_v4  ;;  %vm301_vm0 = vcmp.eq.s32.totalorder %v2092_v4, %v2088_v3  ;;  %vm302_vm1 = vcmp.eq.s32.totalorder %v2092_v4, %v2095_v5  ;;  %v2108_v12 = vadd.s32 %v2084_v1, %v268_v6  ;;  %v2111_v13 = vadd.s32 %v2084_v1, %v266_v7  ;;  %v2226_v60 = vld [vmem:[%s2071_s21 + $0x70] sm:$0xff]  ;;  %v2229_v61 = vld [vmem:[%s2071_s21 + $0x78] sm:$0xff]  ;;  %s1504_s13 = sshll.u32 %s3608_s19, 3 }
  0x41   : > { %v2123_v17 = vadd.s32 %v2084_v1, %v265_v8  ;;  %v2126_v18 = vadd.s32 %v2084_v1, %v269_v9  ;;  %v2129_v19 = vadd.s32 %v2084_v1, %v267_v10  ;;  %v2132_v20 = vadd.s32 %v2084_v1, %v270_v11  ;;  %s3204_s25 = scalar_lea.vmem %s3340_s2, %s1504_s13 }
  0x42   : > { %3429 = vst [vmem:[#allocation9_spill] sm:$0xff] %v2108_v12  ;;  %v333_v21 = vsel %vm301_vm0, %v2114_v14, 0.0  ;;  %v334_v22 = vsel %vm302_vm1, %v2117_v15, 0.0  ;;  %vm309_vm2 = vcmp.eq.s32.totalorder %v2108_v12, %v2088_v3  ;;  %vm310_vm3 = vcmp.eq.s32.totalorder %v2108_v12, %v2095_v5 }
  0x43   : > { %3430 = vst [vmem:[#allocation10_spill] sm:$0xff] %v2111_v13  ;;  %v365_v26 = vadd.f32 %v334_v22, %v333_v21  ;;  %v341_v27 = vsel %vm309_vm2, %v2120_v16, 0.0  ;;  %v342_v28 = vsel %vm310_vm3, %v2137_v23, 0.0  ;;  %vm305_vm4 = vcmp.eq.s32.totalorder %v2111_v13, %v2088_v3  ;;  %v2247_v21 = vld [vmem:[%s2071_s21 + $0x90] sm:$0xff] }
  0x44   : > { %3431 = vst [vmem:[#allocation11_spill] sm:$0xff] %v2123_v17  ;;  %v377_v32 = vadd.f32 %v342_v28, %v341_v27  ;;  %vm306_vm5 = vcmp.eq.s32.totalorder %v2111_v13, %v2095_v5  ;;  %v337_v33 = vsel %vm305_vm4, %v2144_v24, 0.0  ;;  %vm303_vm6 = vcmp.eq.s32.totalorder %v2123_v17, %v2088_v3 }
  0x45   : > { %3432 = vst [vmem:[#allocation12_spill] sm:$0xff] %v2126_v18  ;;  %366 = vadd.xlane.f32.xlu0 %v365_v26  ;;  %v338_v35 = vsel %vm306_vm5, %v2147_v25, 0.0  ;;  %vm304_vm7 = vcmp.eq.s32.totalorder %v2123_v17, %v2095_v5  ;;  %v335_v36 = vsel %vm303_vm6, %v2154_v29, 0.0  ;;  %vm311_vm8 = vcmp.eq.s32.totalorder %v2126_v18, %v2088_v3  ;;  %v2255_v26 = vld [vmem:[%s2071_s21 + $0x98] sm:$0xff] }
  0x46   : > { %3433 = vst [vmem:[#allocation13_spill] sm:$0xff] %v2129_v19  ;;  %378 = vadd.xlane.f32.xlu2 %v377_v32  ;;  %v371_v37 = vadd.f32 %v338_v35, %v337_v33  ;;  %v336_v38 = vsel %vm304_vm7, %v2157_v30, 0.0  ;;  %vm312_vm9 = vcmp.eq.s32.totalorder %v2126_v18, %v2095_v5  ;;  %v343_v39 = vsel %vm311_vm8, %v2160_v31, 0.0  ;;  %v2261_v32 = vld [vmem:[%s2071_s21 + $0xb0] sm:$0xff]  ;;  %v2264_v33 = vld [vmem:[%s2071_s21 + $0xb8] sm:$0xff] }
  0x47   : > { %3434 = vst [vmem:[#allocation14_spill] sm:$0xff] %v2132_v20  ;;  %v344_v42 = vsel %vm312_vm9, %v2168_v34, 0.0  ;;  %vm307_vm10 = vcmp.eq.s32.totalorder %v2129_v19, %v2088_v3  ;;  %vm308_vm11 = vcmp.eq.s32.totalorder %v2129_v19, %v2095_v5  ;;  %v368_v43 = vadd.f32 %v336_v38, %v335_v36  ;;  %v2274_v38 = vld [vmem:[%s2071_s21 + $0xa0] sm:$0xff] }
  0x48   : > { %372 = vadd.xlane.f32.xlu1 %v371_v37  ;;  %v380_v44 = vadd.f32 %v344_v42, %v343_v39  ;;  %v339_v45 = vsel %vm307_vm10, %v2181_v40, 0.0  ;;  %v340_v46 = vsel %vm308_vm11, %v2184_v41, 0.0  ;;  %v272_v47 = vadd.s32 64, %v2086_v2  ;;  %v2277_v39 = vld [vmem:[%s2071_s21 + $0xa8] sm:$0xff] }
  0x49   : > { %vm313_vm12 = vcmp.eq.s32.totalorder %v2132_v20, %v2088_v3  ;;  %vm314_vm13 = vcmp.eq.s32.totalorder %v2132_v20, %v2095_v5  ;;  %v271_v50 = vadd.s32 56, %v2086_v2  ;;  %v273_v51 = vadd.s32 72, %v2086_v2 }
  0x4a   : > { %v2207_v52 = vadd.s32 %v2084_v1, %v272_v47  ;;  %v374_v53 = vadd.f32 %v340_v46, %v339_v45  ;;  %v275_v57 = vadd.s32 88, %v2086_v2  ;;  %v345_v58 = vsel %vm313_vm12, %v2195_v48, 0.0 }
  0x4b   : > { %v2216_v56 = vadd.s32 %v2084_v1, %v271_v50  ;;  %v346_v59 = vsel %vm314_vm13, %v2198_v49, 0.0  ;;  %v2236_v62 = vadd.s32 %v2084_v1, %v273_v51  ;;  %v274_v63 = vadd.s32 80, %v2086_v2 }
  0x4c   : > { %3435 = vst [vmem:[#allocation15_spill] sm:$0xff] %v2207_v52  ;;  %vm317_vm14 = vcmp.eq.s32.totalorder %v2207_v52, %v2088_v3  ;;  %vm318_vm15 = vcmp.eq.s32.totalorder %v2207_v52, %v2095_v5  ;;  %v2242_v7 = vadd.s32 %v2084_v1, %v275_v57  ;;  %v383_v8 = vadd.f32 %v346_v59, %v345_v58  ;;  %v2298_v58 = vld [vmem:[%s2071_s21 + $0xc0] sm:$0xff]  ;;  %v2301_v59 = vld [vmem:[%s2071_s21 + $0xc8] sm:$0xff] }
  0x4d   : > { %3436 = vst [vmem:[#allocation16_spill] sm:$0xff] %v2216_v56  ;;  %369 = vadd.xlane.f32.xlu0 %v368_v43  ;;  %vm315_vm0 = vcmp.eq.s32.totalorder %v2216_v56, %v2088_v3  ;;  %vm316_vm1 = vcmp.eq.s32.totalorder %v2216_v56, %v2095_v5  ;;  %v349_v0 = vsel %vm317_vm14, %v2210_v54, 0.0  ;;  %v350_v6 = vsel %vm318_vm15, %v2213_v55, 0.0 }
  0x4e   : > { %381 = vadd.xlane.f32.xlu2 %v380_v44  ;;  %3437 = vst [vmem:[#allocation17_spill] sm:$0xff] %v2236_v62  ;;  %v347_v9 = vsel %vm315_vm0, %v2226_v60, 0.0  ;;  %v348_v10 = vsel %vm316_vm1, %v2229_v61, 0.0  ;;  %v389_v11 = vadd.f32 %v350_v6, %v349_v0  ;;  %vm319_vm2 = vcmp.eq.s32.totalorder %v2236_v62, %v2088_v3  ;;  %v2309_v6 = vld [vmem:[%s2071_s21 + $0xe0] sm:$0xff] }
  0x4f   : > { %3438 = vst [vmem:[#allocation18_spill] sm:$0xff] %v2242_v7  ;;  %v2252_v22 = vadd.s32 %v2084_v1, %v274_v63  ;;  %vm320_vm3 = vcmp.eq.s32.totalorder %v2236_v62, %v2095_v5  ;;  %v276_v27 = vadd.s32 96, %v2086_v2  ;;  %v386_v28 = vadd.f32 %v348_v10, %v347_v9 }
  0x50   : > { %375 = vadd.xlane.f32.xlu1 %v374_v53  ;;  %vm323_vm4 = vcmp.eq.s32.totalorder %v2242_v7, %v2088_v3  ;;  %vm324_vm5 = vcmp.eq.s32.totalorder %v2242_v7, %v2095_v5  ;;  %v278_v35 = vadd.s32 112, %v2086_v2  ;;  %v351_v36 = vsel %vm319_vm2, %v2247_v21, 0.0 }
  0x51   : > { %3439 = vst [vmem:[#allocation19_spill] sm:$0xff] %v2252_v22  ;;  %v352_v37 = vsel %vm320_vm3, %v2255_v26, 0.0  ;;  %vm321_vm6 = vcmp.eq.s32.totalorder %v2252_v22, %v2088_v3  ;;  %vm322_vm7 = vcmp.eq.s32.totalorder %v2252_v22, %v2095_v5  ;;  %v277_v42 = vadd.s32 104, %v2086_v2 }
  0x52   : > { %v355_v43 = vsel %vm323_vm4, %v2261_v32, 0.0  ;;  %v356_v44 = vsel %vm324_vm5, %v2264_v33, 0.0  ;;  %v2287_v45 = vadd.s32 %v2084_v1, %v276_v27  ;;  %v2290_v46 = vadd.s32 %v2084_v1, %v278_v35 }
  0x53   : > { %v392_v47 = vadd.f32 %v352_v37, %v351_v36  ;;  %v353_v50 = vsel %vm321_vm6, %v2274_v38, 0.0  ;;  %v354_v51 = vsel %vm322_vm7, %v2277_v39, 0.0  ;;  %v398_v53 = vadd.f32 %v356_v44, %v355_v43  ;;  %v2338_v44 = vld [vmem:[%s2071_s21 + $0xf0] sm:$0xff] }
  0x54   : > { %3440 = vst [vmem:[#allocation20_spill] sm:$0xff] %v2287_v45  ;;  %v2295_v57 = vadd.s32 %v2084_v1, %v277_v42  ;;  %vm325_vm8 = vcmp.eq.s32.totalorder %v2287_v45, %v2088_v3  ;;  %vm326_vm9 = vcmp.eq.s32.totalorder %v2287_v45, %v2095_v5  ;;  %v279_v63 = vadd.s32 120, %v2086_v2  ;;  %v2321_v2 = vld [vmem:[%s2071_s21 + $0xd0] sm:$0xff] }
  0x55   : > { %384 = vadd.xlane.f32.xlu0 %v383_v8  ;;  %3441 = vst [vmem:[#allocation21_spill] sm:$0xff] %v2290_v46  ;;  %v395_v0 = vadd.f32 %v354_v51, %v353_v50  ;;  %v2312_v8 = vld [vmem:[%s2071_s21 + $0xe8] sm:$0xff]  ;;  %vm329_vm10 = vcmp.eq.s32.totalorder %v2290_v46, %v2088_v3  ;;  %vm330_vm11 = vcmp.eq.s32.totalorder %v2290_v46, %v2095_v5  ;;  %v357_v9 = vsel %vm325_vm8, %v2298_v58, 0.0 }
  0x56   : > { %390 = vadd.xlane.f32.xlu2 %v389_v11  ;;  %3442 = vst [vmem:[#allocation22_spill] sm:$0xff] %v2295_v57  ;;  %v358_v10 = vsel %vm326_vm9, %v2301_v59, 0.0  ;;  %v2324_v11 = vld [vmem:[%s2071_s21 + $0xd8] sm:$0xff]  ;;  %vm327_vm12 = vcmp.eq.s32.totalorder %v2295_v57, %v2088_v3  ;;  %vm328_vm13 = vcmp.eq.s32.totalorder %v2295_v57, %v2095_v5  ;;  %v361_v27 = vsel %vm329_vm10, %v2309_v6, 0.0 }
  0x57   : > { %v2333_v35 = vadd.s32 %v2084_v1, %v279_v63  ;;  %v401_v36 = vadd.f32 %v358_v10, %v357_v9  ;;  %v359_v37 = vsel %vm327_vm12, %v2321_v2, 0.0  ;;  %v360_v42 = vsel %vm328_vm13, %v2324_v11, 0.0 }
  0x58   : > { %387 = vadd.xlane.f32.xlu1 %v386_v28  ;;  %v362_v28 = vsel %vm330_vm11, %v2312_v8, 0.0  ;;  %v404_v50 = vadd.f32 %v360_v42, %v359_v37  ;;  %v416_v63 = vmax.f32 %v2154_v29, %v2157_v30  ;;  %v422_v9 = vmax.f32 %v2181_v40, %v2184_v41 }
  0x59   : > { %3443 = vst [vmem:[#allocation23_spill] sm:$0xff] %v2333_v35  ;;  %v407_v43 = vadd.f32 %v362_v28, %v361_v27  ;;  %vm331_vm14 = vcmp.eq.s32.totalorder %v2333_v35, %v2088_v3  ;;  %vm332_vm15 = vcmp.eq.s32.totalorder %v2333_v35, %v2095_v5  ;;  %v419_v3 = vmax.f32 %v2144_v24, %v2147_v25 }
  0x5a   : > { %v363_v1 = vsel %vm331_vm14, %v2338_v44, 0.0  ;;  %v425_v5 = vmax.f32 %v2120_v16, %v2137_v23  ;;  %v428_v10 = vmax.f32 %v2160_v31, %v2168_v34  ;;  %v434_v27 = vmax.f32 %v2226_v60, %v2229_v61 }
  0x5b   : > { %v431_v28 = vmax.f32 %v2195_v48, %v2198_v49  ;;  %v443_v37 = vmax.f32 %v2274_v38, %v2277_v39  ;;  %v440_v42 = vmax.f32 %v2247_v21, %v2255_v26 }
  0x5d   : > { %393 = vadd.xlane.f32.xlu0 %v392_v47  ;;  %v2341_v47 = vld [vmem:[%s2071_s21 + $0xf8] sm:$0xff] }
  0x5e   : > { %399 = vadd.xlane.f32.xlu2 %v398_v53  ;;  %v364_v51 = vsel %vm332_vm15, %v2341_v47, 0.0 }
  0x5f   : > { %v410_v53 = vadd.f32 %v364_v51, %v363_v1  ;;  %v449_v1 = vmax.f32 %v2298_v58, %v2301_v59  ;;  %v455_v51 = vmax.f32 %v2309_v6, %v2312_v8 }
  0x60   : > { %396 = vadd.xlane.f32.xlu1 %v395_v0  ;;  %v413_v0 = vmax.f32 %v2114_v14, %v2117_v15 }
  0x65   : > { %402 = vadd.xlane.f32.xlu0 %v401_v36  ;;  %v437_v36 = vmax.f32 %v2210_v54, %v2213_v55 }
  0x66   : > { %408 = vadd.xlane.f32.xlu2 %v407_v43  ;;  %v446_v43 = vmax.f32 %v2261_v32, %v2264_v33 }
  0x68   : > { %405 = vadd.xlane.f32.xlu1 %v404_v50  ;;  %v452_v50 = vmax.f32 %v2321_v2, %v2324_v11 }
  0x6d   : > { %411 = vadd.xlane.f32.xlu0 %v410_v53  ;;  %v458_v53 = vmax.f32 %v2338_v44, %v2341_v47 }
  0x6e   : > { %417 = vmax.xlane.f32.xlu2 %v416_v63 }
  0x70   : > { %414 = vmax.xlane.f32.xlu1 %v413_v0 }
  0x75   : > { %420 = vmax.xlane.f32.xlu0 %v419_v3 }
  0x76   : > { %426 = vmax.xlane.f32.xlu2 %v425_v5 }
  0x78   : > { %423 = vmax.xlane.f32.xlu1 %v422_v9 }
  0x7d   : > { %429 = vmax.xlane.f32.xlu0 %v428_v10 }
  0x7e   : > { %435 = vmax.xlane.f32.xlu2 %v434_v27 }
  0x80   : > { %432 = vmax.xlane.f32.xlu1 %v431_v28 }
  0x85   : > { %438 = vmax.xlane.f32.xlu0 %v437_v36 }
  0x86   : > { %444 = vmax.xlane.f32.xlu2 %v443_v37 }
  0x88   : > { %441 = vmax.xlane.f32.xlu1 %v440_v42 }
  0x8d   : > { %447 = vmax.xlane.f32.xlu0 %v446_v43 }
  0x8e   : > { %453 = vmax.xlane.f32.xlu2 %v452_v50 }
  0x90   : > { %450 = vmax.xlane.f32.xlu1 %v449_v1 }
  0x95   : > { %456 = vmax.xlane.f32.xlu0 %v455_v51 }
  0x98   : > { %459 = vmax.xlane.f32.xlu1 %v458_v53 }
  0xb8   : > { %v367_v63 = vpop.xlane.xlu0 %366 }
  0xb9   : > { %v379_v0 = vpop.xlane.xlu2 %378 }
  0xbb   : > { %v373_v3 = vpop.xlane.xlu1 %372 }
  0xc0   : > { %v370_v5 = vpop.xlane.xlu0 %369 }
  0xc1   : > { %v2381_v9 = vpop.xlane.xlu2 %381 }
  0xc3   : > { %v2383_v10 = vpop.xlane.xlu1 %375 }
  0xc8   : > { %v2385_v27 = vpop.xlane.xlu0 %384 }
  0xc9   : > { %v2387_v28 = vpop.xlane.xlu2 %390 }
  0xcb   : > { %v2389_v36 = vpop.xlane.xlu1 %387 }
  0xd0   : > { %v2391_v37 = vpop.xlane.xlu0 %393 }
  0xd1   : > { %v2393_v42 = vpop.xlane.xlu2 %399 }
  0xd3   : > { %v2395_v43 = vpop.xlane.xlu1 %396 }
  0xd8   : > { %v2397_v50 = vpop.xlane.xlu0 %402 }
  0xd9   : > { %v2399_v1 = vpop.xlane.xlu2 %408 }
  0xdb   : > { %v2401_v51 = vpop.xlane.xlu1 %405 }
  0xe0   : > { %v2403_v53 = vpop.xlane.xlu0 %411 }
  0xe1   : > { %v418_v57 = vpop.xlane.xlu2 %417 }
  0xe2   : > { %v463_v35 = vsub.f32 %v2154_v29, %v418_v57  ;;  %v464_v46 = vsub.f32 %v2157_v30, %v418_v57  ;;  %v606_v22 = vsub.f32 %v418_v57, %v370_v5 }
  0xe3   : > { %v415_v45 = vpop.xlane.xlu1 %414 }
  0xe4   : > { %v497_v7 = vmul.f32 1.442695, %v463_v35  ;;  %v499_v56 = vmul.f32 1.442695, %v464_v46  ;;  %v622_v62 = vmin.f32 %v606_v22, 60.0  ;;  %v461_v52 = vsub.f32 %v2114_v14, %v415_v45 }
  0xe5   : > { %v462_v12 = vsub.f32 %v2117_v15, %v415_v45  ;;  %v605_v20 = vsub.f32 %v415_v45, %v367_v63 }
  0xe6   : > { %1559 = vpow2.f32 %v497_v7  ;;  %v639_v18 = vmul.f32 1.442695, %v622_v62  ;;  %v493_v17 = vmul.f32 1.442695, %v461_v52 }
  0xe7   : > { %1561 = vpow2.f32 %v499_v56  ;;  %v495_v19 = vmul.f32 1.442695, %v462_v12  ;;  %v621_v13 = vmin.f32 %v605_v20, 60.0 }
  0xe8   : > { %1563 = vpow2.f32 %v639_v18  ;;  %v421_v29 = vpop.xlane.xlu0 %420 }
  0xe9   : > { %1565 = vpow2.f32 %v493_v17  ;;  %v637_v30 = vmul.f32 1.442695, %v621_v13  ;;  %v465_v57 = vsub.f32 %v2144_v24, %v421_v29  ;;  %v466_v46 = vsub.f32 %v2147_v25, %v421_v29  ;;  %v427_v22 = vpop.xlane.xlu2 %426 }
  0xea   : > { %1567 = vpow2.f32 %v495_v19  ;;  %v607_v14 = vsub.f32 %v421_v29, %v373_v3  ;;  %v469_v15 = vsub.f32 %v2120_v16, %v427_v22  ;;  %v470_v7 = vsub.f32 %v2137_v23, %v427_v22 }
  0xeb   : > { %1569 = vpow2.f32 %v637_v30  ;;  %v501_v52 = vmul.f32 1.442695, %v465_v57  ;;  %v503_v56 = vmul.f32 1.442695, %v466_v46  ;;  %v609_v12 = vsub.f32 %v427_v22, %v379_v0  ;;  %v424_v20 = vpop.xlane.xlu1 %423 }
  0xec   : > { %v2413_v18 = vpop.eup %1559  ;;  %v623_v17 = vmin.f32 %v607_v14, 60.0  ;;  %v509_v13 = vmul.f32 1.442695, %v469_v15  ;;  %v511_v62 = vmul.f32 1.442695, %v470_v7  ;;  %v467_v24 = vsub.f32 %v2181_v40, %v424_v20 }
  0xed   : > { %v2416_v25 = vpop.eup %1561  ;;  %1571 = vpow2.f32 %v501_v52  ;;  %v625_v19 = vmin.f32 %v609_v12, 60.0  ;;  %v468_v16 = vsub.f32 %v2184_v41, %v424_v20  ;;  %v608_v23 = vsub.f32 %v424_v20, %v2383_v10 }
  0xee   : > { %3444 = vst [vmem:[#allocation24_spill] sm:$0xff] %v2416_v25  ;;  %v1564_v45 = vpop.eup %1563  ;;  %1573 = vpow2.f32 %v503_v56  ;;  %v641_v35 = vmul.f32 1.442695, %v623_v17  ;;  %v560_v63 = vadd.f32 %v2416_v25, %v2413_v18  ;;  %v505_v5 = vmul.f32 1.442695, %v467_v24 }
  0xef   : > { %v2422_v0 = vpop.eup %1565  ;;  %v2425_v3 = vmul.f32 %v1564_v45, %v2413_v18  ;;  %1575 = vpow2.f32 %v509_v13  ;;  %v645_v40 = vmul.f32 1.442695, %v625_v19  ;;  %v2430_v41 = vmul.f32 %v1564_v45, %v2416_v25 }
  0xf0   : > { %v2427_v29 = vpop.eup %1567  ;;  %1577 = vpow2.f32 %v641_v35  ;;  %v507_v10 = vmul.f32 1.442695, %v468_v16  ;;  %v624_v30 = vmin.f32 %v608_v23, 60.0  ;;  %561 = vadd.xlane.f32.xlu0 %v560_v63  ;;  %v430_v57 = vpop.xlane.xlu0 %429 }
  0xf1   : > { %v1570_v46 = vpop.eup %1569  ;;  %1579 = vpow2.f32 %v511_v62  ;;  %v557_v22 = vadd.f32 %v2427_v29, %v2422_v0  ;;  %v471_v14 = vsub.f32 %v2160_v31, %v430_v57  ;;  %v472_v15 = vsub.f32 %v2168_v34, %v430_v57  ;;  %v436_v7 = vpop.xlane.xlu2 %435 }
  0xf2   : > { %v2437_v52 = vmul.f32 %v1570_v46, %v2422_v0  ;;  %v2440_v56 = vmul.f32 %v1570_v46, %v2427_v29  ;;  %1581 = vpow2.f32 %v645_v40  ;;  %v643_v12 = vmul.f32 1.442695, %v624_v30 }
  0xf3   : > { %v2442_v20 = vpop.eup %1571  ;;  %1583 = vpow2.f32 %v505_v5  ;;  %558 = vadd.xlane.f32.xlu2 %v557_v22  ;;  %v513_v17 = vmul.f32 1.442695, %v471_v14  ;;  %v515_v13 = vmul.f32 1.442695, %v472_v15  ;;  %v610_v62 = vsub.f32 %v430_v57, %v2381_v9  ;;  %v433_v31 = vpop.xlane.xlu1 %432 }
  0xf4   : > { %v2445_v24 = vpop.eup %1573  ;;  %1585 = vpow2.f32 %v507_v10  ;;  %v475_v34 = vsub.f32 %v2226_v60, %v436_v7  ;;  %v476_v19 = vsub.f32 %v2229_v61, %v436_v7  ;;  %v612_v16 = vsub.f32 %v436_v7, %v2389_v36 }
  0xf5   : > { %v2450_v23 = vpop.eup %1575  ;;  %1587 = vpow2.f32 %v643_v12  ;;  %v626_v45 = vmin.f32 %v610_v62, 60.0  ;;  %v473_v35 = vsub.f32 %v2195_v48, %v433_v31  ;;  %v474_v63 = vsub.f32 %v2198_v49, %v433_v31 }
  0xf6   : > { %v1578_v40 = vpop.eup %1577  ;;  %1589 = vpow2.f32 %v513_v17  ;;  %v521_v9 = vmul.f32 1.442695, %v475_v34  ;;  %v523_v5 = vmul.f32 1.442695, %v476_v19  ;;  %v628_v30 = vmin.f32 %v612_v16, 60.0 }
  0xf7   : > { %v2454_v10 = vpop.eup %1579  ;;  %v2457_v60 = vmul.f32 %v1578_v40, %v2442_v20  ;;  %v2460_v61 = vmul.f32 %v1578_v40, %v2445_v24  ;;  %1591 = vpow2.f32 %v515_v13  ;;  %v647_v36 = vmul.f32 1.442695, %v626_v45 }
  0xf8   : > { %v1582_v57 = vpop.eup %1581  ;;  %1593 = vpow2.f32 %v521_v9  ;;  %v651_v48 = vmul.f32 1.442695, %v628_v30  ;;  %v517_v46 = vmul.f32 1.442695, %v473_v35  ;;  %v519_v49 = vmul.f32 1.442695, %v474_v63  ;;  %v439_v22 = vpop.xlane.xlu0 %438 }
  0xf9   : > { %v2462_v14 = vpop.eup %1583  ;;  %v2465_v15 = vmul.f32 %v1582_v57, %v2450_v23  ;;  %v2468_v7 = vmul.f32 %v1582_v57, %v2454_v10  ;;  %1595 = vpow2.f32 %v647_v36  ;;  %v611_v12 = vsub.f32 %v433_v31, %v2385_v27  ;;  %v445_v19 = vpop.xlane.xlu2 %444 }
  0xfa   : > { %v2471_v17 = vpop.eup %1585  ;;  %1597 = vpow2.f32 %v523_v5  ;;  %v563_v13 = vadd.f32 %v2445_v24, %v2442_v20  ;;  %v569_v62 = vadd.f32 %v2454_v10, %v2450_v23  ;;  %v477_v34 = vsub.f32 %v2210_v54, %v439_v22 }
  0xfb   : > { %v1588_v16 = vpop.eup %1587  ;;  %1599 = vpow2.f32 %v651_v48  ;;  %v627_v45 = vmin.f32 %v611_v12, 60.0  ;;  %v566_v35 = vadd.f32 %v2471_v17, %v2462_v14  ;;  %v478_v27 = vsub.f32 %v2213_v55, %v439_v22  ;;  %v442_v31 = vpop.xlane.xlu1 %441 }
  0xfc   : > { %v2481_v63 = vpop.eup %1589  ;;  %v2484_v40 = vmul.f32 %v1588_v16, %v2462_v14  ;;  %v2487_v9 = vmul.f32 %v1588_v16, %v2471_v17  ;;  %1601 = vpow2.f32 %v517_v46  ;;  %564 = vadd.xlane.f32.xlu1 %v563_v13  ;;  %570 = vadd.xlane.f32.xlu0 %v569_v62  ;;  %v525_v54 = vmul.f32 1.442695, %v477_v34 }
  0xfd   : > { %v2489_v5 = vpop.eup %1591  ;;  %1603 = vpow2.f32 %v519_v49  ;;  %v649_v30 = vmul.f32 1.442695, %v627_v45  ;;  %567 = vadd.xlane.f32.xlu2 %v566_v35  ;;  %v527_v36 = vmul.f32 1.442695, %v478_v27  ;;  %v613_v55 = vsub.f32 %v439_v22, %v2387_v28 }
  0xfe   : > { %v2492_v57 = vpop.eup %1593  ;;  %1605 = vpow2.f32 %v525_v54  ;;  %v481_v48 = vsub.f32 %v2274_v38, %v445_v19  ;;  %v482_v12 = vsub.f32 %v2277_v39, %v445_v19  ;;  %v615_v46 = vsub.f32 %v445_v19, %v2395_v43 }
  0xff   : > { %v1596_v13 = vpop.eup %1595  ;;  %1607 = vpow2.f32 %v649_v30  ;;  %v629_v62 = vmin.f32 %v613_v55, 60.0  ;;  %v479_v34 = vsub.f32 %v2247_v21, %v442_v31  ;;  %v480_v49 = vsub.f32 %v2255_v26, %v442_v31 }
 0x100   : > { %v2499_v16 = vpop.eup %1597  ;;  %v2502_v28 = vmul.f32 %v1596_v13, %v2481_v63  ;;  %v2505_v22 = vmul.f32 %v1596_v13, %v2489_v5  ;;  %1609 = vpow2.f32 %v527_v36  ;;  %v533_v38 = vmul.f32 1.442695, %v481_v48  ;;  %v448_v27 = vpop.xlane.xlu0 %447 }
 0x101   : > { %3445 = vst [vmem:[#allocation25_spill] sm:$0xff] %v2499_v16  ;;  %v1600_v39 = vpop.eup %1599  ;;  %v653_v45 = vmul.f32 1.442695, %v629_v62  ;;  %v535_v43 = vmul.f32 1.442695, %v482_v12  ;;  %v631_v19 = vmin.f32 %v615_v46, 60.0  ;;  %v614_v35 = vsub.f32 %v442_v31, %v2391_v37  ;;  %v454_v62 = vpop.xlane.xlu2 %453 }
 0x102   : > { %v2508_v21 = vpop.eup %1601  ;;  %v2511_v26 = vmul.f32 %v1600_v39, %v2492_v57  ;;  %v2514_v54 = vmul.f32 %v1600_v39, %v2499_v16  ;;  %1611 = vpow2.f32 %v533_v38  ;;  %v529_v30 = vmul.f32 1.442695, %v479_v34 }
 0x103   : > { %v2516_v55 = vpop.eup %1603  ;;  %1613 = vpow2.f32 %v653_v45  ;;  %v657_v36 = vmul.f32 1.442695, %v631_v19  ;;  %v531_v48 = vmul.f32 1.442695, %v480_v49  ;;  %v630_v12 = vmin.f32 %v614_v35, 60.0  ;;  %v2526_v34 = vpop.xlane.xlu1 %450 }
 0x104   : > { %v2518_v46 = vpop.eup %1605  ;;  %1615 = vpow2.f32 %v535_v43  ;;  %v572_v37 = vadd.f32 %v2489_v5, %v2481_v63  ;;  %v575_v31 = vadd.f32 %v2516_v55, %v2508_v21  ;;  %v578_v13 = vadd.f32 %v2499_v16, %v2492_v57 }
 0x105   : > { %3446 = vst [vmem:[#allocation26_spill] sm:$0xff] %v2518_v46  ;;  %v1608_v38 = vpop.eup %1607  ;;  %1617 = vpow2.f32 %v657_v36  ;;  %v655_v39 = vmul.f32 1.442695, %v630_v12  ;;  %v483_v49 = vsub.f32 %v2261_v32, %v448_v27  ;;  %v484_v45 = vsub.f32 %v2264_v33, %v448_v27 }
 0x106   : > { %v2530_v43 = vpop.eup %1609  ;;  %v2533_v19 = vmul.f32 %v1608_v38, %v2508_v21  ;;  %v2536_v35 = vmul.f32 %v1608_v38, %v2516_v55  ;;  %1619 = vpow2.f32 %v529_v30  ;;  %573 = vadd.xlane.f32.xlu1 %v572_v37  ;;  %576 = vadd.xlane.f32.xlu2 %v575_v31  ;;  %v616_v4 = vsub.f32 %v448_v27, %v2393_v42 }
 0x107   : > { %3447 = vst [vmem:[#allocation27_spill] sm:$0xff] %v2530_v43  ;;  %1621 = vpow2.f32 %v531_v48  ;;  %579 = vadd.xlane.f32.xlu0 %v578_v13  ;;  %v537_v36 = vmul.f32 1.442695, %v483_v49  ;;  %v539_v12 = vmul.f32 1.442695, %v484_v45  ;;  %v487_v32 = vsub.f32 %v2321_v2, %v454_v62  ;;  %v2560_v13 = vld [vmem:[%s2077_s24 + $0x8] sm:$0xff] }
 0x108   : > { %v2540_v33 = vpop.eup %1611  ;;  %1623 = vpow2.f32 %v655_v39  ;;  %v632_v16 = vmin.f32 %v616_v4, 60.0  ;;  %v488_v38 = vsub.f32 %v2324_v11, %v454_v62  ;;  %v618_v30 = vsub.f32 %v454_v62, %v2401_v51  ;;  %v2557_v51 = vld [vmem:[%s2077_s24] sm:$0xff] }
 0x109   : > { %3448 = vst [vmem:[#allocation28_spill] sm:$0xff] %v2540_v33  ;;  %v1614_v37 = vpop.eup %1613  ;;  %1625 = vpow2.f32 %v537_v36  ;;  %v545_v31 = vmul.f32 1.442695, %v487_v32  ;;  %v485_v42 = vsub.f32 %v2298_v58, %v2526_v34  ;;  %v486_v27 = vsub.f32 %v2301_v59, %v2526_v34  ;;  %v457_v59 = vpop.xlane.xlu0 %456 }
 0x10a   : > { %v2548_v2 = vpop.eup %1615  ;;  %v2551_v48 = vmul.f32 %v1614_v37, %v2518_v46  ;;  %v2554_v4 = vmul.f32 %v1614_v37, %v2530_v43  ;;  %1627 = vpow2.f32 %v539_v12  ;;  %v659_v11 = vmul.f32 1.442695, %v632_v16 }
 0x10b   : > { %3449 = vst [vmem:[#allocation29_spill] sm:$0xff] %v2548_v2  ;;  %v1618_v62 = vpop.eup %1617  ;;  %1629 = vpow2.f32 %v545_v31  ;;  %v547_v58 = vmul.f32 1.442695, %v488_v38  ;;  %v634_v39 = vmin.f32 %v618_v30, 60.0  ;;  %v541_v49 = vmul.f32 1.442695, %v485_v42 }
 0x10c   : > { %v2562_v45 = vpop.eup %1619  ;;  %v2565_v36 = vmul.f32 %v1618_v62, %v2540_v33  ;;  %v2568_v32 = vmul.f32 %v1618_v62, %v2548_v2  ;;  %1631 = vpow2.f32 %v659_v11  ;;  %v543_v16 = vmul.f32 1.442695, %v486_v27  ;;  %v460_v62 = vpop.xlane.xlu1 %459 }
 0x10d   : > { %3450 = vst [vmem:[#allocation30_spill] sm:$0xff] %v2562_v45  ;;  %v2570_v12 = vpop.eup %1621  ;;  %1633 = vpow2.f32 %v547_v58  ;;  %v663_v37 = vmul.f32 1.442695, %v634_v39  ;;  %v617_v38 = vsub.f32 %v2526_v34, %v2397_v50  ;;  %v581_v30 = vadd.f32 %v2530_v43, %v2518_v46 }
 0x10e   : > { %vm255_vm0 = vnez %v2557_v51  ;;  %vm256_vm1 = vnez %v2560_v13  ;;  %v1624_v31 = vpop.eup %1623  ;;  %1635 = vpow2.f32 %v541_v49  ;;  %v584_v42 = vadd.f32 %v2570_v12, %v2562_v45 }
 0x10f   : > { %v587_v27 = vadd.f32 %v2548_v2, %v2540_v33  ;;  %v489_v11 = vsub.f32 %v2309_v6, %v457_v59  ;;  %v2583_v58 = vpop.eup %1625  ;;  %v2586_v50 = vmul.f32 %v1624_v31, %v2562_v45  ;;  %v2589_v34 = vmul.f32 %v1624_v31, %v2570_v12  ;;  %582 = vadd.xlane.f32.xlu1 %v581_v30 }
 0x110   : > { %3451 = vst [vmem:[#allocation31_spill] sm:$0xff] %v2583_v58  ;;  %1637 = vpow2.f32 %v663_v37  ;;  %v633_v39 = vmin.f32 %v617_v38, 60.0  ;;  %v2591_v49 = vpop.eup %1627  ;;  %585 = vadd.xlane.f32.xlu2 %v584_v42  ;;  %v490_v2 = vsub.f32 %v2312_v8, %v457_v59  ;;  %v619_v33 = vsub.f32 %v457_v59, %v2399_v1 }
 0x111   : > { %3452 = vst [vmem:[#allocation32_spill] sm:$0xff] %v2591_v49  ;;  %1639 = vpow2.f32 %v543_v16  ;;  %588 = vadd.xlane.f32.xlu0 %v587_v27  ;;  %v549_v6 = vmul.f32 1.442695, %v489_v11  ;;  %v2595_v43 = vpop.eup %1629  ;;  %v491_v45 = vsub.f32 %v2338_v44, %v460_v62  ;;  %v492_v31 = vsub.f32 %v2341_v47, %v460_v62 }
 0x112   : > { %3453 = vst [vmem:[#allocation33_spill] sm:$0xff] %v2595_v43  ;;  %v661_v46 = vmul.f32 1.442695, %v633_v39  ;;  %v620_v37 = vsub.f32 %v460_v62, %v2403_v53  ;;  %v1632_v38 = vpop.eup %1631  ;;  %v551_v30 = vmul.f32 1.442695, %v490_v2  ;;  %v635_v16 = vmin.f32 %v619_v33, 60.0 }
 0x113   : > { %1641 = vpow2.f32 %v549_v6  ;;  %v590_v42 = vadd.f32 %v2591_v49, %v2583_v58  ;;  %v2602_v8 = vpop.eup %1633  ;;  %v2605_v1 = vmul.f32 %v1632_v38, %v2583_v58  ;;  %v2608_v59 = vmul.f32 %v1632_v38, %v2591_v49 }
 0x114   : > { %3454 = vst [vmem:[#allocation34_spill] sm:$0xff] %v2602_v8  ;;  %1643 = vpow2.f32 %v661_v46  ;;  %v553_v44 = vmul.f32 1.442695, %v491_v45  ;;  %v2610_v47 = vpop.eup %1635  ;;  %v665_v53 = vmul.f32 1.442695, %v635_v16  ;;  %v636_v2 = vmin.f32 %v620_v37, 60.0 }
 0x115   : > { %1645 = vpow2.f32 %v551_v30  ;;  %v555_v27 = vmul.f32 1.442695, %v492_v31  ;;  %v596_v11 = vadd.f32 %v2602_v8, %v2595_v43  ;;  %v701_v62 = vadd.f32 1.0, %v2437_v52 }
 0x116   : > { %v1638_v33 = vpop.eup %1637  ;;  %1647 = vpow2.f32 %v553_v44  ;;  %v702_v39 = vadd.f32 1.0, %v2440_v56  ;;  %v667_v31 = vmul.f32 1.442695, %v636_v2  ;;  %v703_v38 = vadd.f32 1.0, %v2425_v3 }
 0x117   : > { %v2616_v6 = vpop.eup %1639  ;;  %v2619_v46 = vmul.f32 %v1638_v33, %v2595_v43  ;;  %v2622_v45 = vmul.f32 %v1638_v33, %v2602_v8  ;;  %1649 = vpow2.f32 %v665_v53  ;;  %591 = vadd.xlane.f32.xlu1 %v590_v42  ;;  %v3378_v56 = vmov 0  }
 0x118   : > { %1651 = vpow2.f32 %v555_v27  ;;  %v593_v37 = vadd.f32 %v2616_v6, %v2610_v47  ;;  %v2632_v30 = vsel %vm255_vm0, 16843009, %v3378_v56  ;;  %v2637_v16 = vsel %vm256_vm1, 16843009, %v3378_v56 }
 0x119   : > { %v2627_v52 = vpop.eup %1641  ;;  %1653 = vpow2.f32 %v667_v31  ;;  %597 = vadd.xlane.f32.xlu0 %v596_v11  ;;  %v704_v42 = vadd.f32 1.0, %v2430_v41  ;;  %v805_v3 = vunpack.c.0.s8 %v2632_v30  ;;  %v806_v53 = vunpack.c.0.s8 %v2637_v16 }
 0x11a   : > { %3455 = vst [vmem:[#allocation35_spill] sm:$0xff] %v2627_v52  ;;  %v1644_v44 = vpop.eup %1643  ;;  %594 = vadd.xlane.f32.xlu2 %v593_v37  ;;  %1655 = vrcp.f32 %v701_v62  ;;  %v807_v27 = vunpack.c.1.s8 %v2632_v30  ;;  %v808_v41 = vunpack.c.1.s8 %v2637_v16  ;;  %v707_v31 = vadd.f32 1.0, %v2484_v40 }
 0x11b   : > { %v2643_v2 = vpop.eup %1645  ;;  %v2646_v51 = vmul.f32 %v1644_v44, %v2610_v47  ;;  %v2649_v13 = vmul.f32 %v1644_v44, %v2616_v6  ;;  %1657 = vrcp.f32 %v702_v39  ;;  %v837_v62 = vpack.c.b16 %v806_v53, %v805_v3 }
 0x11c   : > { %3456 = vst [vmem:[#allocation36_spill] sm:$0xff] %v2643_v2  ;;  %v2652_v33 = vpop.eup %1647  ;;  %v599_v11 = vadd.f32 %v2643_v2, %v2627_v52  ;;  %1659 = vrcp.f32 %v703_v38  ;;  %v839_v56 = vpack.c.b16 %v808_v41, %v807_v27  ;;  %v708_v8 = vadd.f32 1.0, %v2487_v9 }
 0x11d   : > { %3457 = vst [vmem:[#allocation37_spill] sm:$0xff] %v2652_v33  ;;  %v1650_v37 = vpop.eup %1649  ;;  %1661 = vrcp.f32 %v704_v42  ;;  %v811_v44 = vunpack.c.3.s8 %v2632_v30  ;;  %v838_v58 = vpack.c.b8 %v837_v62, %v837_v62  ;;  %v812_v9 = vunpack.c.3.s8 %v2637_v16 }
 0x11e   : > { %v2659_v43 = vpop.eup %1651  ;;  %v2662_v39 = vmul.f32 %v1650_v37, %v2627_v52  ;;  %v2665_v49 = vmul.f32 %v1650_v37, %v2643_v2  ;;  %1663 = vrcp.f32 %v707_v31  ;;  %v840_v42 = vpack.c.b8 %v839_v56, %v839_v56 }
 0x11f   : > { %3458 = vst [vmem:[#allocation38_spill] sm:$0xff] %v2659_v43  ;;  %v1654_v38 = vpop.eup %1653  ;;  %v602_v40 = vadd.f32 %v2659_v43, %v2652_v33  ;;  %1665 = vrcp.f32 %v708_v8  ;;  %600 = vadd.xlane.f32.xlu1 %v599_v11  ;;  %vm869_vm2 = vnez %v838_v58  ;;  %v705_v41 = vadd.f32 1.0, %v2457_v60 }
 0x120   : > { %3459 = vst [vmem:[#allocation39_spill] sm:$0xff] %v2662_v39  ;;  %v1656_v3 = vpop.eup %1655  ;;  %v2671_v53 = vmul.f32 %v1654_v38, %v2652_v33  ;;  %v2674_v27 = vmul.f32 %v1654_v38, %v2659_v43  ;;  %v3461_v37 = vmov 0   ;;  %vm870_vm3 = vnez %v840_v42 }
 0x121   : > { %3460 = vst [vmem:[#allocation40_spill] sm:$0xff] %v2665_v49  ;;  %v1658_v62 = vpop.eup %1657  ;;  %v765_v31 = vmul.f32 %v1656_v3, %v2422_v0  ;;  %v885_v2 = vsel %vm869_vm2, 16843009, %v3461_v37  ;;  %v843_v8 = vpack.c.b16 %v812_v9, %v811_v44  ;;  %v886_v38 = vsel %vm870_vm3, 16843009, %v3461_v37 }
 0x122   : > { %v1660_v56 = vpop.eup %1659  ;;  %603 = vadd.xlane.f32.xlu2 %v602_v40  ;;  %v766_v52 = vmul.f32 %v1658_v62, %v2427_v29  ;;  %v901_v49 = vunpack.c.0.s8 %v885_v2  ;;  %v902_v33 = vunpack.c.1.s8 %v885_v2  ;;  %v903_v11 = vunpack.c.0.s8 %v886_v38 }
 0x123   : > { %v1662_v43 = vpop.eup %1661  ;;  %v767_v58 = vmul.f32 %v1660_v56, %v2413_v18  ;;  %v904_v60 = vunpack.c.1.s8 %v886_v38  ;;  %v844_v39 = vpack.c.b8 %v843_v8, %v843_v8  ;;  %v706_v40 = vadd.f32 1.0, %v2460_v61  ;;  %v249_v38 = vld [vmem:[%s2077_s24 + $0x10] sm:$0xff] }
 0x124   : > { %v1664_v3 = vpop.eup %1663  ;;  %vm2682_vm4 = vcmp.ne.s32.totalorder %v901_v49, 0  ;;  %vm2686_vm5 = vcmp.ne.s32.totalorder %v902_v33, 0  ;;  %v768_v2 = vmul.f32 %v1662_v43, %v2416_v25  ;;  %vm2696_vm6 = vcmp.ne.s32.totalorder %v903_v11, 0  ;;  %v250_v25 = vld [vmem:[%s2077_s24 + $0x18] sm:$0xff] }
 0x125   : > { %v1666_v9 = vpop.eup %1665  ;;  %v965_v62 = vsel %vm2682_vm4, %v765_v31, 0.0  ;;  %v966_v8 = vsel %vm2686_vm5, %v766_v52, 0.0  ;;  %v3466_v49 = vmov 0  ;;  %vm2700_vm7 = vcmp.ne.s32.totalorder %v904_v60, 0 }
 0x126   : > { %v3467_v49 = vsel %vm2696_vm6, 4294967295, %v3466_v49  ;;  %v3469_v33 = vmov 0  ;;  %v997_v56 = vadd.f32 %v966_v8, %v965_v62  ;;  %v967_v43 = vsel %vm2696_vm6, %v767_v58, 0.0 }
 0x127   : > { %3468 = vst [vmem:[#allocation41_spill] sm:$0xff] %v3467_v49  ;;  %v3470_v33 = vsel %vm2700_vm7, 4294967295, %v3469_v33  ;;  %v968_v61 = vsel %vm2700_vm7, %v768_v2, 0.0  ;;  %v771_v31 = vmul.f32 %v1664_v3, %v2462_v14  ;;  %v772_v11 = vmul.f32 %v1666_v9, %v2471_v17 }
 0x128   : > { %3471 = vst [vmem:[#allocation42_spill] sm:$0xff] %v3470_v33  ;;  %v1000_v52 = vadd.f32 %v968_v61, %v967_v43  ;;  %vm872_vm8 = vnez %v844_v39  ;;  %1667 = vrcp.f32 %v705_v41  ;;  %998 = vadd.xlane.f32.xlu0 %v997_v56  ;;  %v809_v62 = vunpack.c.2.s8 %v2632_v30 }
 0x129   : > { %v888_v60 = vsel %vm872_vm8, 16843009, %v3461_v37  ;;  %1669 = vrcp.f32 %v706_v40  ;;  %v810_v58 = vunpack.c.2.s8 %v2637_v16  ;;  %vm257_vm9 = vnez %v249_v38 }
 0x12a   : > { %1001 = vadd.xlane.f32.xlu1 %v1000_v52  ;;  %v907_v8 = vunpack.c.0.s8 %v888_v60  ;;  %v908_v2 = vunpack.c.1.s8 %v888_v60  ;;  %vm258_vm10 = vnez %v250_v25  ;;  %v709_v43 = vadd.f32 1.0, %v2465_v15 }
 0x12b   : > { %v841_v3 = vpack.c.b16 %v810_v58, %v809_v62  ;;  %v710_v9 = vadd.f32 1.0, %v2468_v7  ;;  %v2718_v39 = vsel %vm257_vm9, 16843009, %v3461_v37  ;;  %v2729_v16 = vsel %vm258_vm10, 16843009, %v3461_v37 }
 0x12c   : > { %vm2720_vm11 = vcmp.ne.s32.totalorder %v907_v8, 0  ;;  %vm2724_vm12 = vcmp.ne.s32.totalorder %v908_v2, 0  ;;  %v813_v25 = vunpack.c.0.s8 %v2718_v39  ;;  %1671 = vrcp.f32 %v709_v43 }
 0x12d   : > { %v971_v15 = vsel %vm2720_vm11, %v771_v31, 0.0  ;;  %v972_v7 = vsel %vm2724_vm12, %v772_v11, 0.0  ;;  %v842_v40 = vpack.c.b8 %v841_v3, %v841_v3  ;;  %1673 = vrcp.f32 %v710_v9 }
 0x12e   : > { %v1668_v56 = vpop.eup %1667  ;;  %v1006_v61 = vadd.f32 %v972_v7, %v971_v15  ;;  %v814_v38 = vunpack.c.0.s8 %v2729_v16  ;;  %v713_v52 = vadd.f32 1.0, %v2533_v19  ;;  %v714_v58 = vadd.f32 1.0, %v2536_v35 }
 0x12f   : > { %v1670_v60 = vpop.eup %1669  ;;  %v769_v62 = vmul.f32 %v1668_v56, %v2442_v20  ;;  %vm871_vm13 = vnez %v842_v40  ;;  %v817_v31 = vunpack.c.2.s8 %v2718_v39  ;;  %v818_v19 = vunpack.c.2.s8 %v2729_v16  ;;  %v1823_v56 = vld [vmem:[%s2071_s21 + $0x50] sm:$0xff] }
 0x130   : > { %v770_v8 = vmul.f32 %v1670_v60, %v2445_v24  ;;  %v887_v11 = vsel %vm871_vm13, 16843009, %v3461_v37  ;;  %v845_v2 = vpack.c.b16 %v814_v38, %v813_v25  ;;  %1675 = vrcp.f32 %v713_v52  ;;  %1007 = vadd.xlane.f32.xlu0 %v1006_v61 }
 0x131   : > { %v905_v3 = vunpack.c.0.s8 %v887_v11  ;;  %v906_v43 = vunpack.c.1.s8 %v887_v11  ;;  %1677 = vrcp.f32 %v714_v58  ;;  %v711_v15 = vadd.f32 1.0, %v2502_v28 }
 0x132   : > { %v846_v9 = vpack.c.b8 %v845_v2, %v845_v2  ;;  %v712_v7 = vadd.f32 1.0, %v2505_v22  ;;  %v815_v35 = vunpack.c.1.s8 %v2718_v39  ;;  %v1672_v40 = vpop.eup %1671  ;;  %v849_v61 = vpack.c.b16 %v818_v19, %v817_v31 }
 0x133   : > { %vm2747_vm14 = vcmp.ne.s32.totalorder %v905_v3, 0  ;;  %vm2751_vm15 = vcmp.ne.s32.totalorder %v906_v43, 0  ;;  %v816_v38 = vunpack.c.1.s8 %v2729_v16  ;;  %v1674_v52 = vpop.eup %1673  ;;  %v773_v60 = vmul.f32 %v1672_v40, %v2450_v23 }
 0x134   : > { %v969_v28 = vsel %vm2747_vm14, %v769_v62, 0.0  ;;  %v970_v22 = vsel %vm2751_vm15, %v770_v8, 0.0  ;;  %vm873_vm0 = vnez %v846_v9  ;;  %v774_v11 = vmul.f32 %v1674_v52, %v2454_v10 }
 0x135   : > { %v1003_v58 = vadd.f32 %v970_v22, %v969_v28  ;;  %v889_v2 = vsel %vm873_vm0, 16843009, %v3461_v37  ;;  %v850_v3 = vpack.c.b8 %v849_v61, %v849_v61  ;;  %1679 = vrcp.f32 %v711_v15 }
 0x136   : > { %v1676_v43 = vpop.eup %1675  ;;  %v909_v31 = vunpack.c.0.s8 %v889_v2  ;;  %v910_v19 = vunpack.c.1.s8 %v889_v2  ;;  %v847_v33 = vpack.c.b16 %v816_v38, %v815_v35  ;;  %1681 = vrcp.f32 %v712_v7  ;;  %v251_v2 = vld [vmem:[%s2077_s24 + $0x20] sm:$0xff] }
 0x137   : > { %v1678_v49 = vpop.eup %1677  ;;  %1004 = vadd.xlane.f32.xlu2 %v1003_v58  ;;  %v777_v62 = vmul.f32 %v1676_v43, %v2508_v21  ;;  %vm875_vm1 = vnez %v850_v3  ;;  %v715_v8 = vadd.f32 1.0, %v2511_v26  ;;  %v3482_v40 = vmov 0  ;;  %v252_v43 = vld [vmem:[%s2077_s24 + $0x28] sm:$0xff] }
 0x138   : > { %vm2765_vm2 = vcmp.ne.s32.totalorder %v909_v31, 0  ;;  %vm2769_vm3 = vcmp.ne.s32.totalorder %v910_v19, 0  ;;  %v778_v15 = vmul.f32 %v1678_v49, %v2516_v55  ;;  %v891_v35 = vsel %vm875_vm1, 16843009, %v3461_v37 }
 0x139   : > { %v3483_v40 = vsel %vm2769_vm3, 4294967295, %v3482_v40  ;;  %v973_v61 = vsel %vm2765_vm2, %v773_v60, 0.0  ;;  %v974_v7 = vsel %vm2769_vm3, %v774_v11, 0.0  ;;  %v913_v26 = vunpack.c.0.s8 %v891_v35 }
 0x13a   : > { %v914_v38 = vunpack.c.1.s8 %v891_v35  ;;  %v1009_v52 = vadd.f32 %v974_v7, %v973_v61  ;;  %v848_v28 = vpack.c.b8 %v847_v33, %v847_v33  ;;  %v716_v22 = vadd.f32 1.0, %v2514_v54 }
 0x13b   : > { %1683 = vrcp.f32 %v715_v8  ;;  %vm2780_vm8 = vcmp.ne.s32.totalorder %v913_v26, 0  ;;  %v3484_v58 = vmov 0  ;;  %v3486_v49 = vmov 0  ;;  %v1680_v3 = vpop.eup %1679 }
 0x13c   : > { %v3485_v58 = vsel %vm2780_vm8, 4294967295, %v3484_v58  ;;  %vm2784_vm9 = vcmp.ne.s32.totalorder %v914_v38, 0  ;;  %v819_v60 = vunpack.c.3.s8 %v2718_v39  ;;  %v820_v11 = vunpack.c.3.s8 %v2729_v16  ;;  %1010 = vadd.xlane.f32.xlu1 %v1009_v52  ;;  %v1682_v31 = vpop.eup %1681 }
 0x13d   : > { %v3487_v49 = vsel %vm2784_vm9, 4294967295, %v3486_v49  ;;  %v977_v33 = vsel %vm2780_vm8, %v777_v62, 0.0  ;;  %v978_v54 = vsel %vm2784_vm9, %v778_v15, 0.0  ;;  %vm874_vm10 = vnez %v848_v28 }
 0x13e   : > { %1685 = vrcp.f32 %v716_v22  ;;  %v1015_v19 = vadd.f32 %v978_v54, %v977_v33  ;;  %v775_v8 = vmul.f32 %v1680_v3, %v2481_v63  ;;  %v890_v39 = vsel %vm874_vm10, 16843009, %v3461_v37 }
 0x13f   : > { %v851_v35 = vpack.c.b16 %v820_v11, %v819_v60  ;;  %v776_v16 = vmul.f32 %v1682_v31, %v2489_v5  ;;  %v911_v61 = vunpack.c.0.s8 %v890_v39  ;;  %v912_v7 = vunpack.c.1.s8 %v890_v39 }
 0x140   : > { %vm259_vm13 = vnez %v251_v2  ;;  %1016 = vadd.xlane.f32.xlu0 %v1015_v19  ;;  %vm260_vm0 = vnez %v252_v43  ;;  %v719_v15 = vadd.f32 1.0, %v2586_v50  ;;  %v720_v26 = vadd.f32 1.0, %v2589_v34  ;;  %v3492_v43 = vld [vmem:[#allocation25_spill] sm:$0xff] }
 0x141   : > { %v852_v62 = vpack.c.b8 %v851_v35, %v851_v35  ;;  %v1684_v38 = vpop.eup %1683  ;;  %vm2801_vm1 = vcmp.ne.s32.totalorder %v911_v61, 0  ;;  %vm2805_vm9 = vcmp.ne.s32.totalorder %v912_v7, 0  ;;  %v2810_v22 = vsel %vm259_vm13, 16843009, %v3461_v37 }
 0x142   : > { %v2813_v60 = vsel %vm260_vm0, 16843009, %v3461_v37  ;;  %v975_v50 = vsel %vm2801_vm1, %v775_v8, 0.0  ;;  %v976_v34 = vsel %vm2805_vm9, %v776_v16, 0.0  ;;  %v779_v11 = vmul.f32 %v1684_v38, %v2492_v57 }
 0x143   : > { %vm876_vm10 = vnez %v852_v62  ;;  %v1012_v3 = vadd.f32 %v976_v34, %v975_v50  ;;  %1687 = vrcp.f32 %v719_v15  ;;  %v823_v54 = vunpack.c.1.s8 %v2810_v22  ;;  %v253_v50 = vld [vmem:[%s2077_s24 + $0x30] sm:$0xff] }
 0x144   : > { %v1686_v2 = vpop.eup %1685  ;;  %v892_v33 = vsel %vm876_vm10, 16843009, %v3461_v37  ;;  %1689 = vrcp.f32 %v720_v26  ;;  %v824_v8 = vunpack.c.1.s8 %v2813_v60  ;;  %v717_v35 = vadd.f32 1.0, %v2551_v48 }
 0x145   : > { %v780_v31 = vmul.f32 %v1686_v2, %v3492_v43  ;;  %v915_v19 = vunpack.c.0.s8 %v892_v33  ;;  %v916_v39 = vunpack.c.1.s8 %v892_v33  ;;  %1013 = vadd.xlane.f32.xlu2 %v1012_v3  ;;  %v718_v16 = vadd.f32 1.0, %v2554_v4  ;;  %v254_v33 = vld [vmem:[%s2077_s24 + $0x38] sm:$0xff] }
 0x146   : > { %v821_v61 = vunpack.c.0.s8 %v2810_v22  ;;  %v3493_v7 = vmov 0  ;;  %v3496_v62 = vmov 0  ;;  %v822_v15 = vunpack.c.0.s8 %v2813_v60 }
 0x147   : > { %vm2827_vm13 = vcmp.ne.s32.totalorder %v915_v19, 0  ;;  %vm2831_vm0 = vcmp.ne.s32.totalorder %v916_v39, 0  ;;  %v721_v26 = vadd.f32 1.0, %v2565_v36  ;;  %v855_v38 = vpack.c.b16 %v824_v8, %v823_v54 }
 0x148   : > { %v3494_v7 = vsel %vm2827_vm13, 4294967295, %v3493_v7  ;;  %v3497_v62 = vsel %vm2831_vm0, 4294967295, %v3496_v62  ;;  %v979_v48 = vsel %vm2827_vm13, %v779_v11, 0.0  ;;  %v980_v4 = vsel %vm2831_vm0, %v780_v31, 0.0 }
 0x149   : > { %3495 = vst [vmem:[#allocation25_spill] sm:$0xff] %v3494_v7  ;;  %1691 = vrcp.f32 %v717_v35  ;;  %v1018_v34 = vadd.f32 %v980_v4, %v979_v48  ;;  %v853_v2 = vpack.c.b16 %v822_v15, %v821_v61  ;;  %v722_v3 = vadd.f32 1.0, %v2568_v32  ;;  %v1688_v19 = vpop.eup %1687 }
 0x14a   : > { %3498 = vst [vmem:[#allocation43_spill] sm:$0xff] %v3497_v62  ;;  %1693 = vrcp.f32 %v718_v16  ;;  %v856_v39 = vpack.c.b8 %v855_v38, %v855_v38  ;;  %v825_v36 = vunpack.c.2.s8 %v2810_v22  ;;  %v826_v7 = vunpack.c.2.s8 %v2813_v60  ;;  %v1690_v11 = vpop.eup %1689  ;;  %v3499_v62 = vld [vmem:[#allocation30_spill] sm:$0xff] }
 0x14b   : > { %1695 = vrcp.f32 %v721_v26  ;;  %1019 = vadd.xlane.f32.xlu1 %v1018_v34  ;;  %v783_v31 = vmul.f32 %v1688_v19, %v3499_v62  ;;  %v854_v54 = vpack.c.b8 %v853_v2, %v853_v2  ;;  %v784_v8 = vmul.f32 %v1690_v11, %v2570_v12  ;;  %v3500_v2 = vld [vmem:[#allocation26_spill] sm:$0xff] }
 0x14c   : > { %1697 = vrcp.f32 %v722_v3  ;;  %vm878_vm0 = vnez %v856_v39  ;;  %v857_v35 = vpack.c.b16 %v826_v7, %v825_v36  ;;  %v725_v16 = vadd.f32 1.0, %v2646_v51 }
 0x14d   : > { %v894_v32 = vsel %vm878_vm0, 16843009, %v3461_v37  ;;  %vm877_vm8 = vnez %v854_v54  ;;  %v726_v61 = vadd.f32 1.0, %v2649_v13  ;;  %v3501_v36 = vmov 0  ;;  %v3507_v13 = vld [vmem:[#allocation27_spill] sm:$0xff] }
 0x14e   : > { %v919_v26 = vunpack.c.0.s8 %v894_v32  ;;  %v920_v48 = vunpack.c.1.s8 %v894_v32  ;;  %v893_v4 = vsel %vm877_vm8, 16843009, %v3461_v37  ;;  %v858_v38 = vpack.c.b8 %v857_v35, %v857_v35 }
 0x14f   : > { %v1692_v15 = vpop.eup %1691  ;;  %v917_v19 = vunpack.c.0.s8 %v893_v4  ;;  %v918_v39 = vunpack.c.1.s8 %v893_v4  ;;  %1699 = vrcp.f32 %v725_v16  ;;  %v3504_v51 = vmov 0 }
 0x150   : > { %v1694_v34 = vpop.eup %1693  ;;  %v781_v3 = vmul.f32 %v1692_v15, %v3500_v2  ;;  %vm2853_vm13 = vcmp.ne.s32.totalorder %v919_v26, 0  ;;  %vm2857_vm0 = vcmp.ne.s32.totalorder %v920_v48, 0  ;;  %vm879_vm10 = vnez %v858_v38  ;;  %v3512_v38 = vld [vmem:[#allocation28_spill] sm:$0xff] }
 0x151   : > { %v1696_v7 = vpop.eup %1695  ;;  %v3502_v36 = vsel %vm2853_vm13, 4294967295, %v3501_v36  ;;  %v3505_v51 = vsel %vm2857_vm0, 4294967295, %v3504_v51  ;;  %v782_v11 = vmul.f32 %v1694_v34, %v3507_v13  ;;  %v983_v35 = vsel %vm2853_vm13, %v783_v31, 0.0 }
 0x152   : > { %3503 = vst [vmem:[#allocation30_spill] sm:$0xff] %v3502_v36  ;;  %v1698_v54 = vpop.eup %1697  ;;  %v984_v32 = vsel %vm2857_vm0, %v784_v8, 0.0  ;;  %vm2866_vm8 = vcmp.ne.s32.totalorder %v917_v19, 0  ;;  %v3508_v16 = vmov 0  ;;  %vm2870_vm3 = vcmp.ne.s32.totalorder %v918_v39, 0 }
 0x153   : > { %3506 = vst [vmem:[#allocation26_spill] sm:$0xff] %v3505_v51  ;;  %v3509_v16 = vsel %vm2866_vm8, 4294967295, %v3508_v16  ;;  %v3510_v15 = vmov 0  ;;  %v1024_v26 = vadd.f32 %v984_v32, %v983_v35  ;;  %v981_v48 = vsel %vm2866_vm8, %v781_v3, 0.0  ;;  %v3513_v51 = vld [vmem:[#allocation29_spill] sm:$0xff] }
 0x154   : > { %v3511_v15 = vsel %vm2870_vm3, 4294967295, %v3510_v15  ;;  %v982_v4 = vsel %vm2870_vm3, %v782_v11, 0.0  ;;  %v785_v31 = vmul.f32 %v1696_v7, %v3512_v38  ;;  %v786_v8 = vmul.f32 %v1698_v54, %v3513_v51 }
 0x155   : > { %v1021_v34 = vadd.f32 %v982_v4, %v981_v48  ;;  %v895_v19 = vsel %vm879_vm10, 16843009, %v3461_v37  ;;  %1701 = vrcp.f32 %v726_v61  ;;  %1025 = vadd.xlane.f32.xlu0 %v1024_v26  ;;  %vm3514_vm0 = vnez %v253_v50  ;;  %v1700_v11 = vpop.eup %1699 }
 0x156   : > { %v921_v39 = vunpack.c.0.s8 %v895_v19  ;;  %v922_v36 = vunpack.c.1.s8 %v895_v19  ;;  %v2883_v35 = vsel %vm3514_vm0, 16843009, %v3461_v37  ;;  %vm3515_vm13 = vnez %v254_v33 }
 0x157   : > { %v2887_v3 = vsel %vm3515_vm13, 16843009, %v3461_v37  ;;  %1022 = vadd.xlane.f32.xlu2 %v1021_v34  ;;  %v829_v7 = vunpack.c.0.s8 %v2883_v35  ;;  %v723_v32 = vadd.f32 1.0, %v2605_v1  ;;  %v724_v61 = vadd.f32 1.0, %v2608_v59 }
 0x158   : > { %v830_v54 = vunpack.c.0.s8 %v2887_v3  ;;  %vm2893_vm10 = vcmp.ne.s32.totalorder %v921_v39, 0  ;;  %v3516_v26 = vmov 0  ;;  %vm2897_vm0 = vcmp.ne.s32.totalorder %v922_v36, 0 }
 0x159   : > { %v3517_v26 = vsel %vm2893_vm10, 4294967295, %v3516_v26  ;;  %v3519_v50 = vmov 0  ;;  %v789_v33 = vmul.f32 %v1700_v11, %v2610_v47  ;;  %v827_v48 = vunpack.c.3.s8 %v2810_v22 }
 0x15a   : > { %3518 = vst [vmem:[#allocation27_spill] sm:$0xff] %v3517_v26  ;;  %v3520_v50 = vsel %vm2897_vm0, 4294967295, %v3519_v50  ;;  %v985_v4 = vsel %vm2893_vm10, %v785_v31, 0.0  ;;  %v986_v1 = vsel %vm2897_vm0, %v786_v8, 0.0  ;;  %v861_v34 = vpack.c.b16 %v830_v54, %v829_v7 }
 0x15b   : > { %3521 = vst [vmem:[#allocation44_spill] sm:$0xff] %v3520_v50  ;;  %1703 = vrcp.f32 %v723_v32  ;;  %v1027_v59 = vadd.f32 %v986_v1, %v985_v4  ;;  %v828_v19 = vunpack.c.3.s8 %v2813_v60  ;;  %v727_v36 = vadd.f32 1.0, %v2619_v46  ;;  %v1702_v39 = vpop.eup %1701 }
 0x15c   : > { %1705 = vrcp.f32 %v724_v61  ;;  %v862_v51 = vpack.c.b8 %v861_v34, %v861_v34  ;;  %v728_v11 = vadd.f32 1.0, %v2622_v45  ;;  %v831_v22 = vunpack.c.1.s8 %v2883_v35 }
 0x15d   : > { %v832_v26 = vunpack.c.1.s8 %v2887_v3  ;;  %1028 = vadd.xlane.f32.xlu1 %v1027_v59  ;;  %v790_v31 = vmul.f32 %v1702_v39, %v2616_v6  ;;  %v859_v8 = vpack.c.b16 %v828_v19, %v827_v48  ;;  %1707 = vrcp.f32 %v727_v36  ;;  %v3522_v59 = vld [vmem:[#allocation31_spill] sm:$0xff]  ;;  %v3530_v39 = vld [vmem:[#allocation32_spill] sm:$0xff] }
 0x15e   : > { %v731_v7 = vadd.f32 1.0, %v2671_v53  ;;  %vm881_vm13 = vnez %v862_v51  ;;  %1709 = vrcp.f32 %v728_v11  ;;  %v732_v46 = vadd.f32 1.0, %v2674_v27  ;;  %v3523_v51 = vld [vmem:[#allocation39_spill] sm:$0xff] }
 0x15f   : > { %v863_v60 = vpack.c.b16 %v832_v26, %v831_v22  ;;  %v897_v54 = vsel %vm881_vm13, 16843009, %v3461_v37  ;;  %v860_v32 = vpack.c.b8 %v859_v8, %v859_v8  ;;  %v835_v45 = vunpack.c.3.s8 %v2883_v35 }
 0x160   : > { %1711 = vrcp.f32 %v731_v7  ;;  %v925_v4 = vunpack.c.0.s8 %v897_v54  ;;  %v926_v1 = vunpack.c.1.s8 %v897_v54  ;;  %v836_v53 = vunpack.c.3.s8 %v2887_v3 }
 0x161   : > { %v1704_v61 = vpop.eup %1703  ;;  %v864_v34 = vpack.c.b8 %v863_v60, %v863_v60  ;;  %1713 = vrcp.f32 %v732_v46  ;;  %vm880_vm0 = vnez %v860_v32  ;;  %v729_v26 = vadd.f32 1.0, %v3523_v51 }
 0x162   : > { %v1706_v48 = vpop.eup %1705  ;;  %v787_v19 = vmul.f32 %v1704_v61, %v3522_v59  ;;  %vm2920_vm10 = vcmp.ne.s32.totalorder %v925_v4, 0  ;;  %v3524_v27 = vmov 0  ;;  %vm2924_vm13 = vcmp.ne.s32.totalorder %v926_v1, 0  ;;  %v3531_v4 = vld [vmem:[#allocation33_spill] sm:$0xff] }
 0x163   : > { %v3525_v27 = vsel %vm2920_vm10, 4294967295, %v3524_v27  ;;  %v3527_v36 = vmov 0  ;;  %v788_v11 = vmul.f32 %v1706_v48, %v3530_v39  ;;  %v896_v22 = vsel %vm880_vm0, 16843009, %v3461_v37  ;;  %v1708_v8 = vpop.eup %1707 }
 0x164   : > { %3526 = vst [vmem:[#allocation31_spill] sm:$0xff] %v3525_v27  ;;  %v3528_v36 = vsel %vm2924_vm13, 4294967295, %v3527_v36  ;;  %v989_v7 = vsel %vm2920_vm10, %v789_v33, 0.0  ;;  %v990_v60 = vsel %vm2924_vm13, %v790_v31, 0.0  ;;  %v923_v46 = vunpack.c.0.s8 %v896_v22  ;;  %v1710_v32 = vpop.eup %1709  ;;  %v3536_v33 = vld [vmem:[#allocation34_spill] sm:$0xff] }
 0x165   : > { %3529 = vst [vmem:[#allocation39_spill] sm:$0xff] %v3528_v36  ;;  %v924_v54 = vunpack.c.1.s8 %v896_v22  ;;  %v1033_v61 = vadd.f32 %v990_v60, %v989_v7  ;;  %v791_v1 = vmul.f32 %v1708_v8, %v3531_v4  ;;  %vm882_vm3 = vnez %v864_v34  ;;  %v3537_v60 = vld [vmem:[#allocation37_spill] sm:$0xff] }
 0x166   : > { %v867_v51 = vpack.c.b16 %v836_v53, %v835_v45  ;;  %v1712_v50 = vpop.eup %1711  ;;  %vm2935_vm8 = vcmp.ne.s32.totalorder %v923_v46, 0  ;;  %v792_v36 = vmul.f32 %v1710_v32, %v3536_v33  ;;  %v898_v31 = vsel %vm882_vm3, 16843009, %v3461_v37 }
 0x167   : > { %vm2939_vm0 = vcmp.ne.s32.totalorder %v924_v54, 0  ;;  %v1714_v22 = vpop.eup %1713  ;;  %1034 = vadd.xlane.f32.xlu0 %v1033_v61  ;;  %v987_v8 = vsel %vm2935_vm8, %v787_v19, 0.0  ;;  %v927_v34 = vunpack.c.0.s8 %v898_v31  ;;  %v928_v53 = vunpack.c.1.s8 %v898_v31  ;;  %v3538_v54 = vld [vmem:[#allocation38_spill] sm:$0xff]  ;;  %v3545_v19 = vld [vmem:[#allocation40_spill] sm:$0xff] }
 0x168   : > { %v988_v45 = vsel %vm2939_vm0, %v788_v11, 0.0  ;;  %v795_v46 = vmul.f32 %v1712_v50, %v3537_v60  ;;  %v796_v4 = vmul.f32 %v1714_v22, %v3538_v54  ;;  %v868_v27 = vpack.c.b8 %v867_v51, %v867_v51 }
 0x169   : > { %v1030_v7 = vadd.f32 %v988_v45, %v987_v8  ;;  %vm2951_vm13 = vcmp.ne.s32.totalorder %v927_v34, 0  ;;  %v3539_v32 = vmov 0  ;;  %vm2955_vm3 = vcmp.ne.s32.totalorder %v928_v53, 0  ;;  %v1815_v53 = vld [vmem:[%s2071_s21] sm:$0xff] }
 0x16a   : > { %v3540_v32 = vsel %vm2951_vm13, 4294967295, %v3539_v32  ;;  %v3542_v61 = vmov 0  ;;  %v730_v11 = vadd.f32 1.0, %v3545_v19  ;;  %1715 = vrcp.f32 %v729_v26 }
 0x16b   : > { %3541 = vst [vmem:[#allocation32_spill] sm:$0xff] %v3540_v32  ;;  %v3543_v61 = vsel %vm2955_vm3, 4294967295, %v3542_v61  ;;  %1031 = vadd.xlane.f32.xlu2 %v1030_v7  ;;  %v991_v50 = vsel %vm2951_vm13, %v791_v1, 0.0  ;;  %v992_v51 = vsel %vm2955_vm3, %v792_v36, 0.0  ;;  %vm884_vm10 = vnez %v868_v27  ;;  %v1816_v1 = vld [vmem:[%s2071_s21 + $0x8] sm:$0xff]  ;;  %v1817_v36 = vld [vmem:[%s2071_s21 + $0x20] sm:$0xff] }
 0x16c   : > { %3544 = vst [vmem:[#allocation34_spill] sm:$0xff] %v3543_v61  ;;  %v833_v31 = vunpack.c.2.s8 %v2883_v35  ;;  %v1036_v22 = vadd.f32 %v992_v51, %v991_v50  ;;  %v900_v8 = vsel %vm884_vm10, 16843009, %v3461_v37  ;;  %1717 = vrcp.f32 %v730_v11  ;;  %v1818_v50 = vld [vmem:[%s2071_s21 + $0x28] sm:$0xff] }
 0x16d   : > { %v834_v45 = vunpack.c.2.s8 %v2887_v3  ;;  %v931_v34 = vunpack.c.0.s8 %v900_v8  ;;  %v932_v26 = vunpack.c.1.s8 %v900_v8  ;;  %v1045_v7 = vmul.f32 %v1815_v53, %v2422_v0 }
 0x16e   : > { %v1046_v19 = vmul.f32 %v1816_v1, %v2427_v29  ;;  %1037 = vadd.xlane.f32.xlu1 %v1036_v22  ;;  %v1049_v35 = vmul.f32 %v1817_v36, %v2442_v20  ;;  %v1050_v51 = vmul.f32 %v1818_v50, %v2445_v24  ;;  %v1819_v24 = vld [vmem:[%s2071_s21 + $0x10] sm:$0xff]  ;;  %v1055_v25 = vmul.f32 %v1823_v56, %v2481_v63 }
 0x16f   : > { %v865_v27 = vpack.c.b16 %v834_v45, %v833_v31  ;;  %vm2975_vm10 = vcmp.ne.s32.totalorder %v931_v34, 0  ;;  %vm2979_vm3 = vcmp.ne.s32.totalorder %v932_v26, 0  ;;  %v1077_v0 = vmul.f32 %v1815_v53, %v1045_v7 }
 0x170   : > { %v1078_v8 = vmul.f32 %v1816_v1, %v1046_v19  ;;  %v1716_v61 = vpop.eup %1715  ;;  %v995_v29 = vsel %vm2975_vm10, %v795_v46, 0.0  ;;  %v996_v20 = vsel %vm2979_vm3, %v796_v4, 0.0  ;;  %v1047_v22 = vmul.f32 %v1819_v24, %v2413_v18  ;;  %v3550_v1 = vld [vmem:[#allocation35_spill] sm:$0xff]  ;;  %v3551_v19 = vld [vmem:[#allocation36_spill] sm:$0xff] }
 0x171   : > { %v866_v31 = vpack.c.b8 %v865_v27, %v865_v27  ;;  %v1042_v45 = vadd.f32 %v996_v20, %v995_v29  ;;  %v1109_v34 = vsel %vm2682_vm4, %v1077_v0, 0.0  ;;  %v1081_v53 = vmul.f32 %v1817_v36, %v1049_v35  ;;  %v1820_v29 = vld [vmem:[%s2071_s21 + $0x18] sm:$0xff]  ;;  %v3552_v20 = vld [vmem:[#allocation24_spill] sm:$0xff] }
 0x172   : > { %v1110_v26 = vsel %vm2686_vm5, %v1078_v8, 0.0  ;;  %v1718_v7 = vpop.eup %1717  ;;  %v1082_v46 = vmul.f32 %v1818_v50, %v1050_v51  ;;  %v793_v4 = vmul.f32 %v1716_v61, %v3550_v1  ;;  %v1048_v42 = vmul.f32 %v1820_v29, %v3552_v20  ;;  %v1821_v8 = vld [vmem:[%s2071_s21 + $0x30] sm:$0xff]  ;;  %v1822_v51 = vld [vmem:[%s2071_s21 + $0x38] sm:$0xff] }
 0x173   : > { %vm883_vm13 = vnez %v866_v31  ;;  %1043 = vadd.xlane.f32.xlu0 %v1042_v45  ;;  %v794_v27 = vmul.f32 %v1718_v7, %v3551_v19  ;;  %v1141_v44 = vadd.f32 %v1110_v26, %v1109_v34  ;;  %v1051_v36 = vmul.f32 %v1821_v8, %v2462_v14  ;;  %v1824_v7 = vld [vmem:[%s2071_s21 + $0x58] sm:$0xff] }
 0x174   : > { %v899_v18 = vsel %vm883_vm13, 16843009, %v3461_v37  ;;  %v1113_v35 = vsel %vm2747_vm14, %v1081_v53, 0.0  ;;  %v1114_v61 = vsel %vm2751_vm15, %v1082_v46, 0.0  ;;  %v1079_v50 = vmul.f32 %v1819_v24, %v1047_v22 }
 0x175   : > { %v929_v0 = vunpack.c.0.s8 %v899_v18  ;;  %v930_v32 = vunpack.c.1.s8 %v899_v18  ;;  %v1052_v37 = vmul.f32 %v1822_v51, %v2471_v17  ;;  %v1083_v14 = vmul.f32 %v1821_v8, %v1051_v36  ;;  %v1828_v8 = vld [vmem:[%s2071_s21 + $0x68] sm:$0xff]  ;;  %v3076_v36 = vpop.xlane.xlu1 %564 }
 0x176   : > { %1142 = vadd.xlane.f32.xlu1 %v1141_v44  ;;  %v1080_v22 = vmul.f32 %v1820_v29, %v1048_v42  ;;  %v1147_v26 = vadd.f32 %v1114_v61, %v1113_v35  ;;  %v1056_v46 = vmul.f32 %v1824_v7, %v2489_v5  ;;  %v1087_v18 = vmul.f32 %v1823_v56, %v1055_v25  ;;  %v1827_v44 = vld [vmem:[%s2071_s21 + $0x60] sm:$0xff]  ;;  %v1830_v56 = vld [vmem:[%s2071_s21 + $0x88] sm:$0xff] }
 0x177   : > { %vm3006_vm4 = vcmp.ne.s32.totalorder %v929_v0, 0  ;;  %vm3010_vm5 = vcmp.ne.s32.totalorder %v930_v32, 0  ;;  %v1084_v34 = vmul.f32 %v1822_v51, %v1052_v37  ;;  %v1115_v53 = vsel %vm2720_vm11, %v1083_v14, 0.0  ;;  %v1829_v14 = vld [vmem:[%s2071_s21 + $0x80] sm:$0xff] }
 0x178   : > { %v993_v24 = vsel %vm3006_vm4, %v793_v4, 0.0  ;;  %v994_v17 = vsel %vm3010_vm5, %v794_v27, 0.0  ;;  %v1825_v4 = vld [vmem:[%s2071_s21 + $0x40] sm:$0xff]  ;;  %v1826_v27 = vld [vmem:[%s2071_s21 + $0x48] sm:$0xff]  ;;  %v1111_v41 = vsel %vm2696_vm6, %v1079_v50, 0.0  ;;  %v1088_v0 = vmul.f32 %v1824_v7, %v1056_v46 }
 0x179   : > { %v1039_v32 = vadd.f32 %v994_v17, %v993_v24  ;;  %v1116_v63 = vsel %vm2724_vm12, %v1084_v34, 0.0  ;;  %v1053_v20 = vmul.f32 %v1825_v4, %v2450_v23  ;;  %v1054_v29 = vmul.f32 %v1826_v27, %v2454_v10  ;;  %v1831_v34 = vld [vmem:[%s2071_s21 + $0x70] sm:$0xff] }
 0x17a   : > { %v1057_v5 = vmul.f32 %v1827_v44, %v2508_v21  ;;  %v1058_v30 = vmul.f32 %v1828_v8, %v2516_v55  ;;  %v1112_v23 = vsel %vm2700_vm7, %v1080_v22, 0.0  ;;  %v1150_v35 = vadd.f32 %v1116_v63, %v1115_v53  ;;  %v1833_v63 = vld [vmem:[%s2071_s21 + $0x90] sm:$0xff] }
 0x17b   : > { %1040 = vadd.xlane.f32.xlu2 %v1039_v32  ;;  %1148 = vadd.xlane.f32.xlu0 %v1147_v26  ;;  %v1085_v61 = vmul.f32 %v1825_v4, %v1053_v20  ;;  %v1086_v51 = vmul.f32 %v1826_v27, %v1054_v29  ;;  %v1061_v50 = vmul.f32 %v1829_v14, %v3500_v2  ;;  %v1119_v55 = vsel %vm2801_vm1, %v1087_v18, 0.0  ;;  %v1832_v32 = vld [vmem:[%s2071_s21 + $0x78] sm:$0xff]  ;;  %v3062_v20 = vpop.xlane.xlu0 %561 }
 0x17c   : > { %v1089_v10 = vmul.f32 %v1827_v44, %v1057_v5  ;;  %v1090_v37 = vmul.f32 %v1828_v8, %v1058_v30  ;;  %v1062_v21 = vmul.f32 %v1830_v56, %v3507_v13  ;;  %v1120_v25 = vsel %vm2805_vm9, %v1088_v0, 0.0  ;;  %v3564_v27 = vld [vmem:[#allocation43_spill] sm:$0xff] }
 0x17d   : > { %v1117_v24 = vsel %vm2765_vm2, %v1085_v61, 0.0  ;;  %vm3559_vm6 = vnez %v3483_v40  ;;  %vm3560_vm7 = vnez %v3485_v58  ;;  %vm3561_vm11 = vnez %v3487_v49  ;;  %v1834_v49 = vld [vmem:[%s2071_s21 + $0x98] sm:$0xff]  ;;  %v3568_v61 = vld [vmem:[#allocation30_spill] sm:$0xff] }
 0x17e   : > { %v1118_v17 = vsel %vm3559_vm6, %v1086_v51, 0.0  ;;  %1151 = vadd.xlane.f32.xlu1 %v1150_v35  ;;  %v1121_v2 = vsel %vm3560_vm7, %v1089_v10, 0.0  ;;  %v1122_v52 = vsel %vm3561_vm11, %v1090_v37, 0.0  ;;  %v1059_v28 = vmul.f32 %v1831_v34, %v2492_v57  ;;  %v3562_v57 = vld [vmem:[#allocation25_spill] sm:$0xff]  ;;  %v1836_v44 = vld [vmem:[%s2071_s21 + $0xb8] sm:$0xff]  ;;  %v3082_v10 = vpop.xlane.xlu2 %558 }
 0x17f   : > { %v1153_v22 = vadd.f32 %v1118_v17, %v1117_v24  ;;  %v1159_v13 = vadd.f32 %v1122_v52, %v1121_v2  ;;  %v1060_v9 = vmul.f32 %v1832_v32, %v3492_v43  ;;  %v1144_v26 = vadd.f32 %v1112_v23, %v1111_v41  ;;  %v1835_v41 = vld [vmem:[%s2071_s21 + $0xb0] sm:$0xff]  ;;  %v1840_v24 = vld [vmem:[%s2071_s21 + $0xa8] sm:$0xff] }
 0x180   : > { %v1156_v40 = vadd.f32 %v1120_v25, %v1119_v55  ;;  %v1093_v53 = vmul.f32 %v1829_v14, %v1061_v50  ;;  %v1094_v7 = vmul.f32 %v1830_v56, %v1062_v21  ;;  %v1091_v46 = vmul.f32 %v1831_v34, %v1059_v28  ;;  %v1838_v14 = vld [vmem:[%s2071_s21 + $0xc8] sm:$0xff]  ;;  %v1839_v21 = vld [vmem:[%s2071_s21 + $0xa0] sm:$0xff] }
 0x181   : > { %v1092_v58 = vmul.f32 %v1832_v32, %v1060_v9  ;;  %v1063_v18 = vmul.f32 %v1833_v63, %v3499_v62  ;;  %v1064_v4 = vmul.f32 %v1834_v49, %v2570_v12  ;;  %vm3563_vm12 = vnez %v3562_v57  ;;  %v3572_v55 = vld [vmem:[#allocation28_spill] sm:$0xff]  ;;  %v3573_v17 = vld [vmem:[#allocation29_spill] sm:$0xff] }
 0x182   : > { %v1123_v43 = vsel %vm3563_vm12, %v1091_v46, 0.0  ;;  %vm3565_vm14 = vnez %v3564_v27  ;;  %v1067_v0 = vmul.f32 %v1835_v41, %v3522_v59  ;;  %v1068_v62 = vmul.f32 %v1836_v44, %v3530_v39  ;;  %v3570_v39 = vld [vmem:[#allocation26_spill] sm:$0xff]  ;;  %v1841_v34 = vld [vmem:[%s2071_s21 + $0xe0] sm:$0xff]  ;;  %v1842_v32 = vld [vmem:[%s2071_s21 + $0xe8] sm:$0xff] }
 0x183   : > { %1145 = vadd.xlane.f32.xlu2 %v1144_v26  ;;  %1157 = vadd.xlane.f32.xlu0 %v1156_v40  ;;  %v1124_v29 = vsel %vm3565_vm14, %v1092_v58, 0.0  ;;  %vm3566_vm15 = vnez %v3509_v16  ;;  %vm3567_vm2 = vnez %v3511_v15  ;;  %v1095_v8 = vmul.f32 %v1833_v63, %v1063_v18  ;;  %v1837_v15 = vld [vmem:[%s2071_s21 + $0xc0] sm:$0xff]  ;;  %v3092_v52 = vpop.xlane.xlu0 %570  ;;  %v3576_v46 = vld [vmem:[#allocation39_spill] sm:$0xff]  ;;  %v1843_v58 = vld [vmem:[%s2071_s21 + $0xf0] sm:$0xff] }
 0x184   : > { %v1162_v42 = vadd.f32 %v1124_v29, %v1123_v43  ;;  %v1125_v12 = vsel %vm3566_vm15, %v1093_v53, 0.0  ;;  %v1126_v5 = vsel %vm3567_vm2, %v1094_v7, 0.0  ;;  %v1096_v30 = vmul.f32 %v1834_v49, %v1064_v4  ;;  %v3574_v7 = vld [vmem:[#allocation31_spill] sm:$0xff]  ;;  %v3110_v49 = vpop.xlane.xlu1 %573 }
 0x185   : > { %v1165_v23 = vadd.f32 %v1126_v5, %v1125_v12  ;;  %v1099_v35 = vmul.f32 %v1835_v41, %v1067_v0  ;;  %v1100_v59 = vmul.f32 %v1836_v44, %v1068_v62  ;;  %vm3569_vm9 = vnez %v3568_v61  ;;  %v1844_v18 = vld [vmem:[%s2071_s21 + $0xf8] sm:$0xff]  ;;  %v1845_v41 = vld [vmem:[%s2071_s21 + $0xd0] sm:$0xff]  ;;  %v3580_v0 = vld [vmem:[#allocation33_spill] sm:$0xff] }
 0x186   : > { %1160 = vadd.xlane.f32.xlu1 %v1159_v13  ;;  %v1127_v51 = vsel %vm3569_vm9, %v1095_v8, 0.0  ;;  %vm3571_vm1 = vnez %v3570_v39  ;;  %v1069_v37 = vmul.f32 %v1837_v15, %v2610_v47  ;;  %v1070_v50 = vmul.f32 %v1838_v14, %v2616_v6  ;;  %v568_v57 = vpop.xlane.xlu2 %567  ;;  %v3578_v43 = vld [vmem:[#allocation27_spill] sm:$0xff]  ;;  %v3581_v62 = vld [vmem:[#allocation44_spill] sm:$0xff] }
 0x187   : > { %v1128_v16 = vsel %vm3571_vm1, %v1096_v30, 0.0  ;;  %v1065_v25 = vmul.f32 %v1839_v21, %v3572_v55  ;;  %v1066_v2 = vmul.f32 %v1840_v24, %v3573_v17  ;;  %v1131_v47 = vsel %vm2935_vm8, %v1099_v35, 0.0  ;;  %v1846_v12 = vld [vmem:[%s2071_s21 + $0xd8] sm:$0xff] }
 0x188   : > { %v1168_v56 = vadd.f32 %v1128_v16, %v1127_v51  ;;  %v1132_v6 = vsel %vm2939_vm0, %v1100_v59, 0.0  ;;  %v1101_v13 = vmul.f32 %v1837_v15, %v1069_v37  ;;  %v1073_v28 = vmul.f32 %v1841_v34, %v3550_v1  ;;  %v3583_v15 = vld [vmem:[#allocation32_spill] sm:$0xff]  ;;  %v3585_v37 = vld [vmem:[#allocation34_spill] sm:$0xff] }
 0x189   : > { %v1074_v9 = vmul.f32 %v1842_v32, %v3551_v19  ;;  %v1174_v26 = vadd.f32 %v1132_v6, %v1131_v47  ;;  %v1097_v40 = vmul.f32 %v1839_v21, %v1065_v25  ;;  %v1098_v53 = vmul.f32 %v1840_v24, %v1066_v2 }
 0x18a   : > { %vm3575_vm13 = vnez %v3574_v7  ;;  %vm3577_vm8 = vnez %v3576_v46  ;;  %v1075_v63 = vmul.f32 %v1843_v58, %v3537_v60  ;;  %v1076_v1 = vmul.f32 %v1844_v18, %v3538_v54 }
 0x18b   : > { %1154 = vadd.xlane.f32.xlu2 %v1153_v22  ;;  %1166 = vadd.xlane.f32.xlu0 %v1165_v23  ;;  %v1102_v22 = vmul.f32 %v1838_v14, %v1070_v50  ;;  %v1133_v48 = vsel %vm3575_vm13, %v1101_v13, 0.0  ;;  %v1105_v19 = vmul.f32 %v1841_v34, %v1073_v28  ;;  %v1106_v4 = vmul.f32 %v1842_v32, %v1074_v9  ;;  %v3124_v23 = vpop.xlane.xlu0 %579 }
 0x18c   : > { %vm3579_vm0 = vnez %v3578_v43  ;;  %v1071_v44 = vmul.f32 %v1845_v41, %v3580_v0  ;;  %vm3582_vm6 = vnez %v3581_v62  ;;  %v1072_v54 = vmul.f32 %v1846_v12, %v3536_v33  ;;  %v3130_v16 = vpop.xlane.xlu1 %582 }
 0x18d   : > { %v1134_v38 = vsel %vm3577_vm8, %v1102_v22, 0.0  ;;  %v1129_v27 = vsel %vm3579_vm0, %v1097_v40, 0.0  ;;  %v1130_v60 = vsel %vm3582_vm6, %v1098_v53, 0.0  ;;  %v1107_v5 = vmul.f32 %v1843_v58, %v1075_v63 }
 0x18e   : > { %1169 = vadd.xlane.f32.xlu1 %v1168_v56  ;;  %v1177_v29 = vadd.f32 %v1134_v38, %v1133_v48  ;;  %v1108_v8 = vmul.f32 %v1844_v18, %v1076_v1  ;;  %v1138_v30 = vsel %vm3010_vm5, %v1106_v4, 0.0  ;;  %v1171_v35 = vadd.f32 %v1130_v60, %v1129_v27  ;;  %v577_v50 = vpop.xlane.xlu2 %576 }
 0x18f   : > { %v1103_v59 = vmul.f32 %v1845_v41, %v1071_v44  ;;  %v1104_v51 = vmul.f32 %v1846_v12, %v1072_v54  ;;  %v1139_v39 = vsel %vm2975_vm10, %v1107_v5, 0.0  ;;  %vm3586_vm5 = vnez %v3585_v37 }
 0x190   : > { %v1140_v33 = vsel %vm2979_vm3, %v1108_v8, 0.0  ;;  %1719 = vrcp.f32 %v3082_v10  ;;  %vm1381_vm10 = vcmask 7168  }
 0x191   : > { %v1186_v31 = vadd.f32 %v1140_v33, %v1139_v39  ;;  %v1136_v14 = vsel %vm3586_vm5, %v1104_v51, 0.0  ;;  %1721 = vlog2.f32 %v3082_v10 }
 0x192   : > { %1723 = vrcp.f32 %v3062_v20 }
 0x193   : > { %1163 = vadd.xlane.f32.xlu2 %v1162_v42  ;;  %1175 = vadd.xlane.f32.xlu0 %v1174_v26  ;;  %v1137_v42 = vsel %vm3006_vm4, %v1105_v19, 0.0  ;;  %vm3584_vm4 = vnez %v3583_v15  ;;  %v3136_v21 = vpop.xlane.xlu0 %588  ;;  %1725 = vlog2.f32 %v3062_v20 }
 0x194   : > { %v1183_v61 = vadd.f32 %v1138_v30, %v1137_v42  ;;  %v1135_v45 = vsel %vm3584_vm4, %v1103_v59, 0.0  ;;  %v3138_v11 = vpop.xlane.xlu1 %591  ;;  %1727 = vrcp.f32 %v3076_v36 }
 0x195   : > { %v1180_v56 = vadd.f32 %v1136_v14, %v1135_v45 }
 0x196   : > { %1178 = vadd.xlane.f32.xlu1 %v1177_v29  ;;  %v3140_v3 = vpop.xlane.xlu2 %585  ;;  %v1720_v53 = vpop.eup %1719 }
 0x197   : > { %v1722_v48 = vpop.eup %1721 }
 0x198   : > { %v3168_v10 = vpop.eup %1723  ;;  %v1254_v62 = vmul.f32 0.6931472, %v1722_v48 }
 0x199   : > { %v1726_v46 = vpop.eup %1725 }
 0x19a   : > { %v3171_v38 = vpop.eup %1727  ;;  %v1256_v37 = vmul.f32 0.6931472, %v1726_v46 }
 0x19b   : > { %1172 = vadd.xlane.f32.xlu2 %v1171_v35  ;;  %1184 = vadd.xlane.f32.xlu0 %v1183_v61  ;;  %v3142_v55 = vpop.xlane.xlu0 %597  ;;  %v3587_v61 = vld [vmem:[#allocation8_spill] sm:$0xff] }
 0x19c   : > { %v3144_v25 = vpop.xlane.xlu1 %600  ;;  %vm1349_vm3 = vcmp.lt.s32.totalorder %v3587_v61, 200 }
 0x19e   : > { %1187 = vadd.xlane.f32.xlu1 %v1186_v31  ;;  %v3146_v24 = vpop.xlane.xlu2 %594 }
 0x1a3   : > { %1181 = vadd.xlane.f32.xlu2 %v1180_v56  ;;  %v999_v17 = vpop.xlane.xlu0 %998 }
 0x1a4   : > { %v1002_v2 = vpop.xlane.xlu1 %1001  ;;  %1729 = vlog2.f32 %v999_v17 }
 0x1a5   : > { %1731 = vlog2.f32 %v3076_v36 }
 0x1a6   : > { %v3148_v47 = vpop.xlane.xlu2 %603  ;;  %1733 = vrcp.f32 %v568_v57 }
 0x1a7   : > { %1735 = vlog2.f32 %v568_v57 }
 0x1a8   : > { %1737 = vrcp.f32 %v3092_v52 }
 0x1aa   : > { %v1730_v20 = vpop.eup %1729 }
 0x1ab   : > { %v1008_v6 = vpop.xlane.xlu0 %1007  ;;  %v1732_v36 = vpop.eup %1731  ;;  %v1206_v19 = vmul.f32 0.6931472, %v1730_v20 }
 0x1ac   : > { %v3178_v63 = vpop.eup %1733 }
 0x1ad   : > { %v1736_v1 = vpop.eup %1735  ;;  %v1237_v29 = vsub.f32 0.0, %v1206_v19 }
 0x1ae   : > { %v1005_v22 = vpop.xlane.xlu2 %1004  ;;  %v3183_v4 = vpop.eup %1737 }
 0x1af   : > { %v3150_v13 = vpop.xlane.xlu1 %1010  ;;  %1739 = vlog2.f32 %v1005_v22  ;;  %v1285_v5 = vadd.f32 %v1254_v62, %v1237_v29 }
 0x1b0   : > { %1741 = vlog2.f32 %v3092_v52 }
 0x1b1   : > { %1743 = vrcp.f32 %v3110_v49 }
 0x1b2   : > { %1745 = vlog2.f32 %v1008_v6 }
 0x1b3   : > { %v1017_v34 = vpop.xlane.xlu0 %1016  ;;  %1747 = vlog2.f32 %v3110_v49 }
 0x1b4   : > { %1749 = vrcp.f32 %v577_v50 }
 0x1b5   : > { %v1740_v57 = vpop.eup %1739  ;;  %1751 = vlog2.f32 %v1002_v2 }
 0x1b6   : > { %v3187_v43 = vpop.eup %1741  ;;  %1753 = vlog2.f32 %v577_v50  ;;  %v1210_v49 = vmul.f32 0.6931472, %v1740_v57 }
 0x1b7   : > { %v3189_v27 = vpop.eup %1743 }
 0x1b8   : > { %v1014_v32 = vpop.xlane.xlu2 %1013  ;;  %v1746_v41 = vpop.eup %1745  ;;  %v1239_v35 = vsub.f32 0.0, %v1210_v49  ;;  %v3589_v49 = vld [vmem:[#allocation13_spill] sm:$0xff] }
 0x1b9   : > { %1755 = vlog2.f32 %v1014_v32  ;;  %v1748_v44 = vpop.eup %1747  ;;  %v1212_v8 = vmul.f32 0.6931472, %v1746_v41  ;;  %v3588_v32 = vld [vmem:[#allocation10_spill] sm:$0xff]  ;;  %vm1352_vm11 = vcmp.lt.s32.totalorder %v3589_v49, 200 }
 0x1ba   : > { %1757 = vrcp.f32 %v3124_v23  ;;  %v3193_v12 = vpop.eup %1749  ;;  %vm1351_vm7 = vcmp.lt.s32.totalorder %v3588_v32, 200  ;;  %v1264_v48 = vmul.f32 0.6931472, %v1748_v44  ;;  %v3592_v32 = vld [vmem:[#allocation14_spill] sm:$0xff] }
 0x1bb   : > { %1759 = vlog2.f32 %v3124_v23  ;;  %v1752_v54 = vpop.eup %1751  ;;  %v1240_v14 = vsub.f32 0.0, %v1212_v8  ;;  %vm1355_vm15 = vcmp.lt.s32.totalorder %v3592_v32, 200 }
 0x1bc   : > { %1761 = vlog2.f32 %v1017_v34  ;;  %v1754_v30 = vpop.eup %1753  ;;  %v1208_v31 = vmul.f32 0.6931472, %v1752_v54  ;;  %v1260_v34 = vmul.f32 0.6931472, %v1736_v1 }
 0x1bd   : > { %1763 = vrcp.f32 %v3130_v16 }
 0x1be   : > { %v3152_v28 = vpop.xlane.xlu1 %1019  ;;  %1765 = vlog2.f32 %v3130_v16  ;;  %v1258_v16 = vmul.f32 0.6931472, %v1732_v36  ;;  %v1238_v46 = vsub.f32 0.0, %v1208_v31  ;;  %v3591_v31 = vld [vmem:[#allocation12_spill] sm:$0xff] }
 0x1bf   : > { %v1756_v23 = vpop.eup %1755  ;;  %1767 = vlog2.f32 %v3150_v13  ;;  %vm1354_vm14 = vcmp.lt.s32.totalorder %v3591_v31, 200 }
 0x1c0   : > { %v3206_v33 = vpop.eup %1757  ;;  %1769 = vrcp.f32 %v3140_v3  ;;  %v1287_v17 = vadd.f32 %v1258_v16, %v1239_v35  ;;  %v1216_v2 = vmul.f32 0.6931472, %v1756_v23 }
 0x1c1   : > { %v3209_v45 = vpop.eup %1759 }
 0x1c2   : > { %v1762_v56 = vpop.eup %1761  ;;  %v1242_v57 = vsub.f32 0.0, %v1216_v2 }
 0x1c3   : > { %v3218_v22 = vpop.eup %1763  ;;  %v1218_v36 = vmul.f32 0.6931472, %v1762_v56 }
 0x1c4   : > { %v1290_v61 = vadd.f32 %v1264_v48, %v1242_v57 }
 0x1c8   : > { %v3154_v9 = vpop.xlane.xlu0 %1025 }
 0x1ca   : > { %v3162_v40 = vpop.xlane.xlu2 %1022 }
 0x1cb   : > { %1771 = vlog2.f32 %v3162_v40 }
 0x1cc   : > { %1773 = vlog2.f32 %v3140_v3 }
 0x1cd   : > { %1775 = vrcp.f32 %v3136_v21 }
 0x1ce   : > { %1777 = vlog2.f32 %v3154_v9 }
 0x1cf   : > { %1779 = vlog2.f32 %v3136_v21 }
 0x1d0   : > { %v3158_v26 = vpop.xlane.xlu1 %1028  ;;  %1781 = vrcp.f32 %v3138_v11 }
 0x1d1   : > { %1783 = vlog2.f32 %v3152_v28 }
 0x1d2   : > { %1785 = vlog2.f32 %v3138_v11 }
 0x1da   : > { %v3166_v7 = vpop.xlane.xlu0 %1034 }
 0x1de   : > { %v3180_v18 = vpop.xlane.xlu2 %1031 }
 0x1df   : > { %1787 = vlog2.f32 %v3180_v18 }
 0x1e0   : > { %1789 = vrcp.f32 %v3146_v24 }
 0x1e1   : > { %v3175_v58 = vpop.xlane.xlu1 %1037  ;;  %1791 = vlog2.f32 %v3166_v7 }
 0x1e2   : > { %1793 = vlog2.f32 %v3146_v24 }
 0x1e3   : > { %1795 = vlog2.f32 %v3158_v26 }
 0x1e6   : > { %v3185_v52 = vpop.xlane.xlu0 %1043 }
 0x1e9   : > { %v1143_v0 = vpop.xlane.xlu1 %1142 }
 0x1ea   : > { %v1301_v60 = vmul.f32 0.5, %v1143_v0  ;;  %v1266_v0 = vmul.f32 0.6931472, %v1754_v30 }
 0x1ec   : > { %v1317_v42 = vmul.f32 %v1720_v53, %v1301_v60  ;;  %v1766_v53 = vpop.eup %1765  ;;  %v1286_v60 = vadd.f32 %v1256_v37, %v1238_v46  ;;  %v1262_v37 = vmul.f32 0.6931472, %v3187_v43 }
 0x1ed   : > { %v1768_v20 = vpop.eup %1767  ;;  %v1270_v48 = vmul.f32 0.6931472, %v1766_v53 }
 0x1ee   : > { %v3197_v59 = vpop.xlane.xlu2 %1040  ;;  %v1333_v51 = vadd.f32 %v1317_v42, %v1285_v5  ;;  %v1149_v39 = vpop.xlane.xlu0 %1148  ;;  %v1214_v54 = vmul.f32 0.6931472, %v1768_v20  ;;  %v1243_v42 = vsub.f32 0.0, %v1218_v36 }
 0x1ef   : > { %v1303_v15 = vmul.f32 0.5, %v1149_v39  ;;  %v3225_v1 = vpop.eup %1769  ;;  %1797 = vlog2.f32 %v3197_v59  ;;  %v3594_v59 = vld [vmem:[#allocation15_spill] sm:$0xff] }
 0x1f0   : > { %v1365_v50 = vsel %vm1349_vm3, %v1333_v51, 0.0  ;;  %v1772_v9 = vpop.eup %1771  ;;  %v3590_v51 = vld [vmem:[#allocation11_spill] sm:$0xff]  ;;  %1799 = vrcp.f32 %v3144_v25  ;;  %vm1357_vm9 = vcmp.lt.s32.totalorder %v3594_v59, 200 }
 0x1f1   : > { %1382 = vst.msk [vmem:[%s3204_s25] sm:$0xff] %vm1381_vm10, %v1365_v50  ;;  %v1319_v6 = vmul.f32 %v3171_v38, %v1303_v15  ;;  %v1152_v13 = vpop.xlane.xlu1 %1151  ;;  %v1288_v38 = vadd.f32 %v1260_v34, %v1240_v14  ;;  %v1774_v62 = vpop.eup %1773  ;;  %v1222_v23 = vmul.f32 0.6931472, %v1772_v9  ;;  %vm1350_vm12 = vcmp.lt.s32.totalorder %v3590_v51, 200  ;;  %v3593_v9 = vld [vmem:[#allocation9_spill] sm:$0xff] }
 0x1f2   : > { %v1304_v40 = vmul.f32 0.5, %v1152_v13  ;;  %v3235_v8 = vpop.eup %1775  ;;  %v1241_v14 = vsub.f32 0.0, %v1214_v54  ;;  %v1272_v24 = vmul.f32 0.6931472, %v1774_v62  ;;  %vm1353_vm2 = vcmp.lt.s32.totalorder %v3593_v9, 200 }
 0x1f3   : > { %v1335_v3 = vadd.f32 %v1319_v6, %v1287_v17  ;;  %v1778_v35 = vpop.eup %1777  ;;  %v1245_v34 = vsub.f32 0.0, %v1222_v23  ;;  %1801 = vlog2.f32 %v3185_v52  ;;  %v3595_v23 = vld [vmem:[#allocation17_spill] sm:$0xff]  ;;  %v1268_v52 = vmul.f32 0.6931472, %v3209_v45 }
 0x1f4   : > { %v1320_v19 = vmul.f32 %v3178_v63, %v1304_v40  ;;  %v3245_v16 = vpop.eup %1779  ;;  %v1224_v17 = vmul.f32 0.6931472, %v1778_v35  ;;  %v1289_v20 = vadd.f32 %v1262_v37, %v1241_v14  ;;  %1803 = vlog2.f32 %v3144_v25 }
 0x1f5   : > { %v1367_v41 = vsel %vm1351_vm7, %v1335_v3, 0.0  ;;  %v3249_v15 = vpop.eup %1781  ;;  %vm1358_vm1 = vcmp.lt.s32.totalorder %v3595_v23, 200  ;;  %1805 = vlog2.f32 %v3148_v47  ;;  %v1274_v32 = vmul.f32 0.6931472, %v3245_v16 }
 0x1f6   : > { %v1146_v29 = vpop.xlane.xlu2 %1145  ;;  %1384 = vst.msk [vmem:[%s3204_s25 + $0x10] sm:$0xff] %vm1381_vm10, %v1367_v41  ;;  %v1336_v44 = vadd.f32 %v1320_v19, %v1288_v38  ;;  %v1158_v63 = vpop.xlane.xlu0 %1157  ;;  %v1246_v57 = vsub.f32 0.0, %v1224_v17  ;;  %v1293_v41 = vadd.f32 %v1270_v48, %v1245_v34  ;;  %1807 = vlog2.f32 %v3175_v58 }
 0x1f7   : > { %v1302_v21 = vmul.f32 0.5, %v1146_v29  ;;  %v1306_v5 = vmul.f32 0.5, %v1158_v63  ;;  %v1784_v56 = vpop.eup %1783  ;;  %1809 = vlog2.f32 %v3142_v55 }
 0x1f8   : > { %v1368_v28 = vsel %vm1352_vm11, %v1336_v44, 0.0  ;;  %v1786_v13 = vpop.eup %1785  ;;  %v1220_v38 = vmul.f32 0.6931472, %v1784_v56  ;;  %1811 = vrcp.f32 %v3148_v47 }
 0x1f9   : > { %v1318_v30 = vmul.f32 %v3168_v10, %v1302_v21  ;;  %1385 = vst.msk [vmem:[%s3204_s25 + $0x18] sm:$0xff] %vm1381_vm10, %v1368_v28  ;;  %v1322_v11 = vmul.f32 %v3189_v27, %v1306_v5  ;;  %v1161_v39 = vpop.xlane.xlu1 %1160  ;;  %v1291_v27 = vadd.f32 %v1266_v0, %v1243_v42  ;;  %v1788_v40 = vpop.eup %1787  ;;  %v1294_v5 = vadd.f32 %v1272_v24, %v1246_v57  ;;  %v3598_v57 = vld [vmem:[#allocation20_spill] sm:$0xff] }
 0x1fa   : > { %v1307_v10 = vmul.f32 0.5, %v1161_v39  ;;  %v3265_v19 = vpop.eup %1789  ;;  %v1228_v49 = vmul.f32 0.6931472, %v1788_v40  ;;  %v1244_v62 = vsub.f32 0.0, %v1220_v38  ;;  %vm1361_vm0 = vcmp.lt.s32.totalorder %v3598_v57, 200 }
 0x1fb   : > { %v1334_v18 = vadd.f32 %v1318_v30, %v1286_v60  ;;  %v1338_v50 = vadd.f32 %v1322_v11, %v1290_v61  ;;  %v1792_v53 = vpop.eup %1791  ;;  %1813 = vrcp.f32 %v3142_v55 }
 0x1fc   : > { %v1323_v6 = vmul.f32 %v3193_v12, %v1307_v10  ;;  %v1794_v63 = vpop.eup %1793  ;;  %v1230_v42 = vmul.f32 0.6931472, %v1792_v53  ;;  %v1248_v28 = vsub.f32 0.0, %v1228_v49  ;;  %v1292_v37 = vadd.f32 %v1268_v52, %v1244_v62 }
 0x1fd   : > { %v1366_v2 = vsel %vm1350_vm12, %v1334_v18, 0.0  ;;  %v1370_v7 = vsel %vm1354_vm14, %v1338_v50, 0.0  ;;  %v1796_v54 = vpop.eup %1795  ;;  %v1276_v18 = vmul.f32 0.6931472, %v1786_v13  ;;  %v1278_v58 = vmul.f32 0.6931472, %v1794_v63 }
 0x1fe   : > { %1383 = vst.msk [vmem:[%s3204_s25 + $0x8] sm:$0xff] %vm1381_vm10, %v1366_v2  ;;  %v1155_v43 = vpop.xlane.xlu2 %1154  ;;  %v1339_v12 = vadd.f32 %v1323_v6, %v1291_v27  ;;  %v1167_v3 = vpop.xlane.xlu0 %1166  ;;  %v1226_v25 = vmul.f32 0.6931472, %v1796_v54  ;;  %v1249_v14 = vsub.f32 0.0, %v1230_v42  ;;  %v3596_v2 = vld [vmem:[#allocation16_spill] sm:$0xff] }
 0x1ff   : > { %v1305_v46 = vmul.f32 0.5, %v1155_v43  ;;  %1387 = vst.msk [vmem:[%s3204_s25 + $0x28] sm:$0xff] %vm1381_vm10, %v1370_v7  ;;  %v1309_v36 = vmul.f32 0.5, %v1167_v3  ;;  %v1798_v51 = vpop.eup %1797  ;;  %v1296_v27 = vadd.f32 %v1276_v18, %v1248_v28  ;;  %vm1356_vm13 = vcmp.lt.s32.totalorder %v3596_v2, 200  ;;  %v3597_v43 = vld [vmem:[#allocation18_spill] sm:$0xff] }
 0x200   : > { %v1371_v26 = vsel %vm1355_vm15, %v1339_v12, 0.0  ;;  %v1800_v10 = vpop.eup %1799  ;;  %v1234_v17 = vmul.f32 0.6931472, %v1798_v51  ;;  %vm1360_vm8 = vcmp.lt.s32.totalorder %v3597_v43, 200  ;;  %v1247_v40 = vsub.f32 0.0, %v1226_v25  ;;  %v3601_v51 = vld [vmem:[#allocation23_spill] sm:$0xff] }
 0x201   : > { %v1321_v29 = vmul.f32 %v3183_v4, %v1305_v46  ;;  %1388 = vst.msk [vmem:[%s3204_s25 + $0x30] sm:$0xff] %vm1381_vm10, %v1371_v26  ;;  %v1325_v0 = vmul.f32 %v3218_v22, %v1309_v36  ;;  %v1170_v21 = vpop.xlane.xlu1 %1169  ;;  %v1802_v56 = vpop.eup %1801  ;;  %v1297_v12 = vadd.f32 %v1278_v58, %v1249_v14  ;;  %vm1364_vm5 = vcmp.lt.s32.totalorder %v3601_v51, 200 }
 0x202   : > { %v1310_v4 = vmul.f32 0.5, %v1170_v21  ;;  %v1236_v3 = vmul.f32 0.6931472, %v1802_v56  ;;  %v1251_v38 = vsub.f32 0.0, %v1234_v17 }
 0x203   : > { %v1337_v44 = vadd.f32 %v1321_v29, %v1289_v20  ;;  %v1341_v60 = vadd.f32 %v1325_v0, %v1293_v41 }
 0x204   : > { %v1326_v22 = vmul.f32 %v3225_v1, %v1310_v4  ;;  %v1252_v47 = vsub.f32 0.0, %v1236_v3  ;;  %v3599_v4 = vld [vmem:[#allocation19_spill] sm:$0xff] }
 0x205   : > { %v1369_v30 = vsel %vm1353_vm2, %v1337_v44, 0.0  ;;  %v1373_v61 = vsel %vm1357_vm9, %v1341_v60, 0.0  ;;  %vm1359_vm6 = vcmp.lt.s32.totalorder %v3599_v4, 200 }
 0x206   : > { %1386 = vst.msk [vmem:[%s3204_s25 + $0x20] sm:$0xff] %vm1381_vm10, %v1369_v30  ;;  %v1164_v35 = vpop.xlane.xlu2 %1163  ;;  %v1342_v39 = vadd.f32 %v1326_v22, %v1294_v5  ;;  %v1176_v1 = vpop.xlane.xlu0 %1175  ;;  %v3600_v5 = vld [vmem:[#allocation21_spill] sm:$0xff] }
 0x207   : > { %v1308_v11 = vmul.f32 0.5, %v1164_v35  ;;  %1390 = vst.msk [vmem:[%s3204_s25 + $0x40] sm:$0xff] %vm1381_vm10, %v1373_v61  ;;  %v1312_v31 = vmul.f32 0.5, %v1176_v1  ;;  %vm1363_vm4 = vcmp.lt.s32.totalorder %v3600_v5, 200 }
 0x208   : > { %v1374_v45 = vsel %vm1358_vm1, %v1342_v39, 0.0 }
 0x209   : > { %v1324_v50 = vmul.f32 %v3206_v33, %v1308_v11  ;;  %1391 = vst.msk [vmem:[%s3204_s25 + $0x48] sm:$0xff] %vm1381_vm10, %v1374_v45  ;;  %v1328_v6 = vmul.f32 %v3249_v15, %v1312_v31  ;;  %v1179_v13 = vpop.xlane.xlu1 %1178  ;;  %v1804_v33 = vpop.eup %1803 }
 0x20a   : > { %v1313_v7 = vmul.f32 0.5, %v1179_v13  ;;  %v1806_v46 = vpop.eup %1805  ;;  %v1282_v41 = vmul.f32 0.6931472, %v1804_v33 }
 0x20b   : > { %v1340_v34 = vadd.f32 %v1324_v50, %v1292_v37  ;;  %v1344_v48 = vadd.f32 %v1328_v6, %v1296_v27  ;;  %v1808_v20 = vpop.eup %1807  ;;  %v1284_v60 = vmul.f32 0.6931472, %v1806_v46 }
 0x20c   : > { %v1329_v24 = vmul.f32 %v3265_v19, %v1313_v7  ;;  %v1295_v19 = vadd.f32 %v1274_v32, %v1247_v40  ;;  %v1232_v9 = vmul.f32 0.6931472, %v1808_v20  ;;  %v1810_v44 = vpop.eup %1809  ;;  %v1299_v59 = vadd.f32 %v1282_v41, %v1251_v38 }
 0x20d   : > { %v1372_v15 = vsel %vm1356_vm13, %v1340_v34, 0.0  ;;  %v1376_v36 = vsel %vm1360_vm8, %v1344_v48, 0.0  ;;  %v1812_v30 = vpop.eup %1811  ;;  %v1300_v28 = vadd.f32 %v1284_v60, %v1252_v47  ;;  %v1280_v52 = vmul.f32 0.6931472, %v1810_v44 }
 0x20e   : > { %1389 = vst.msk [vmem:[%s3204_s25 + $0x38] sm:$0xff] %vm1381_vm10, %v1372_v15  ;;  %v1173_v16 = vpop.xlane.xlu2 %1172  ;;  %v1345_v26 = vadd.f32 %v1329_v24, %v1297_v12  ;;  %v1185_v53 = vpop.xlane.xlu0 %1184  ;;  %v1250_v22 = vsub.f32 0.0, %v1232_v9 }
 0x20f   : > { %v1311_v29 = vmul.f32 0.5, %v1173_v16  ;;  %1393 = vst.msk [vmem:[%s3204_s25 + $0x58] sm:$0xff] %vm1381_vm10, %v1376_v36  ;;  %v1315_v49 = vmul.f32 0.5, %v1185_v53  ;;  %v1814_v1 = vpop.eup %1813 }
 0x210   : > { %v1377_v21 = vsel %vm1361_vm0, %v1345_v26, 0.0  ;;  %v1298_v18 = vadd.f32 %v1280_v52, %v1250_v22 }
 0x211   : > { %v1327_v0 = vmul.f32 %v3235_v8, %v1311_v29  ;;  %1394 = vst.msk [vmem:[%s3204_s25 + $0x60] sm:$0xff] %vm1381_vm10, %v1377_v21  ;;  %v1331_v63 = vmul.f32 %v1800_v10, %v1315_v49  ;;  %v1188_v62 = vpop.xlane.xlu1 %1187  ;;  %v3602_v10 = vld [vmem:[#allocation22_spill] sm:$0xff] }
 0x212   : > { %v1316_v42 = vmul.f32 0.5, %v1188_v62  ;;  %vm1362_vm3 = vcmp.lt.s32.totalorder %v3602_v10, 200 }
 0x213   : > { %v1343_v54 = vadd.f32 %v1327_v0, %v1295_v19  ;;  %v1347_v8 = vadd.f32 %v1331_v63, %v1299_v59 }
 0x214   : > { %v1332_v35 = vmul.f32 %v1812_v30, %v1316_v42 }
 0x215   : > { %v1375_v55 = vsel %vm1359_vm6, %v1343_v54, 0.0  ;;  %v1379_v23 = vsel %vm1363_vm4, %v1347_v8, 0.0 }
 0x216   : > { %1392 = vst.msk [vmem:[%s3204_s25 + $0x50] sm:$0xff] %vm1381_vm10, %v1375_v55  ;;  %v1182_v61 = vpop.xlane.xlu2 %1181  ;;  %v1348_v39 = vadd.f32 %v1332_v35, %v1300_v28 }
 0x217   : > { %v1314_v11 = vmul.f32 0.5, %v1182_v61  ;;  %1396 = vst.msk [vmem:[%s3204_s25 + $0x70] sm:$0xff] %vm1381_vm10, %v1379_v23 }
 0x218   : > { %v1380_v31 = vsel %vm1364_vm5, %v1348_v39, 0.0 }
 0x219   : > { %v1330_v25 = vmul.f32 %v1814_v1, %v1314_v11  ;;  %1397 = vst.msk [vmem:[%s3204_s25 + $0x78] sm:$0xff] %vm1381_vm10, %v1380_v31 }
 0x21b   : > { %v1346_v37 = vadd.f32 %v1330_v25, %v1298_v18 }
 0x21d   : > { %v1378_v14 = vsel %vm1362_vm3, %v1346_v37, 0.0 }
 0x21e   : > { %1395 = vst.msk [vmem:[%s3204_s25 + $0x68] sm:$0xff] %vm1381_vm10, %v1378_v14 }
 0x21f PF: > { %p15_p8 = scmp.ge.s32.totalorder %s1987_s14, 4   ;;  %s3603_s9 = smov %s1937_s10 }
 0x220   : > { %s3604_s10 = smov %s1941_s11  ;;  %s3605_s11 = smov %s1997_s17 }
 0x221   : > { %s3606_s12 = smov %s1987_s14  ;;  %17 = sbr.rel (!%p15_p8) target bundleno = 5 (0x5), region = 81 }
 0x226   :  { %1420 = vsyncpa [#allocation3], 1 }
 0x227   :  { %1422 = vsyncpa [#allocation3 + $0x1], 1 }
 0x228   :  { %1423 = vsyncpa [#allocation5], 1 }
 0x229   :  { %1425 = vsyncpa [#allocation5 + $0x1], 1 }

</bundles_post_ra>
